<compile_context>
chip_gen: v6e
topology: v6e:2x2x1
jax: 0.10.0
libtpu: 0.0.40
codegen_flags: <defaults>
</compile_context>

<pallas_src>
import jax
import jax.numpy as jnp
import numpy as np
from jax.experimental import pallas as pl
from jax.experimental.pallas import tpu as pltpu

LANE = 128
SUBLANE = 8


def _rup(x, m):
    return (x + m - 1) // m * m


def _n_arrays(c):
    """Number of packed weight arrays a layer contributes."""
    n = 4                       # w1_last, b1, w2_last, b2
    if c["K"] > 1:
        n += 2                  # w1_rest, w2_rest
    if c["has_ds"]:
        n += 1                  # bd
    return n


# ---------------------------------------------------------------------------
# Fused multi-layer TCN kernel (built per static layer configuration)
# ---------------------------------------------------------------------------
def _make_kernel(cfgs, TL):
    n_w = sum(_n_arrays(c) for c in cfgs)

    def kernel(*refs):
        x_ref = refs[0]                     # (1, TL, cin0_p)
        w_refs = refs[1:1 + n_w]            # per-layer packed weights
        o_ref = refs[1 + n_w]               # (1, TL, cout_last_p)
        s_refs = refs[2 + n_w:]             # 2 bf16 history buffers per layer

        l = pl.program_id(1)                # time-tile index (sequential axis)
        cur = x_ref[0].astype(jnp.float32)  # (TL, cin0_p) current layer input

        wi = 0
        for i, c in enumerate(cfgs):
            K, dil, H, Hp = c["K"], c["dil"], c["H"], c["Hp"]
            cp_in, cp_out = c["cin_p"], c["cout_p"]
            has_ds = c["has_ds"]

            abuf = s_refs[2 * i]            # (Hp+TL, cp_in)  bf16
            hbuf = s_refs[2 * i + 1]        # (Hp+TL, cp_out) bf16

            if K > 1:
                w1r = w_refs[wi]; wi += 1           # (K-1, cp_in, cp_out) bf16
            w1l = w_refs[wi]; b1 = w_refs[wi + 1]   # shift-0 tap (+ fused ds), bias
            wi += 2
            if has_ds:
                bd = w_refs[wi]; wi += 1
            if K > 1:
                w2r = w_refs[wi]; wi += 1           # (K-1, cp_out, cp_out) bf16
            w2l = w_refs[wi]; b2 = w_refs[wi + 1]
            wi += 2

            # ---- refresh causal history (last H rows of everything seen so far).
            # The copy is a value-semantics read-then-write, so the
            # self-overlapping case TL < H is handled correctly.
            if H > 0:
                @pl.when(l == 0)
                def _(abuf=abuf, hbuf=hbuf, H=H, Hp=Hp, ci=cp_in, co=cp_out):
                    abuf[Hp - H:Hp, :] = jnp.zeros((H, ci), jnp.bfloat16)
                    hbuf[Hp - H:Hp, :] = jnp.zeros((H, co), jnp.bfloat16)

                @pl.when(l > 0)
                def _(abuf=abuf, hbuf=hbuf, H=H, Hp=Hp):
                    a_hist = abuf[Hp + TL - H:Hp + TL, :]
                    h_hist = hbuf[Hp + TL - H:Hp + TL, :]
                    abuf[Hp - H:Hp, :] = a_hist
                    hbuf[Hp - H:Hp, :] = h_hist

            cur_bf = cur.astype(jnp.bfloat16)
            abuf[Hp:Hp + TL, :] = cur_bf    # aligned sublane store (history feed)

            # ---- conv1: shift-0 tap (+ fused 1x1 downsample) from the LIVE value
            z = jnp.dot(cur_bf, w1l[...], preferred_element_type=jnp.float32)
            if has_ds:
                res = z[:, cp_out:] + bd[...]
                z = z[:, :cp_out]
            else:
                res = cur                   # identity residual (cp_in == cp_out)
            # remaining taps: per-tap accumulated matmuls from the history buffer
            for k in range(K - 1):
                s = (K - 1 - k) * dil
                z = z + jnp.dot(abuf[Hp - s:Hp - s + TL, :], w1r[k],
                                preferred_element_type=jnp.float32)
            y1 = jnp.maximum(z + b1[...], 0.0)

            # ---- conv2 ----
            y1_bf = y1.astype(jnp.bfloat16)
            hbuf[Hp:Hp + TL, :] = y1_bf
            z2 = jnp.dot(y1_bf, w2l[...], preferred_element_type=jnp.float32)
            for k in range(K - 1):
                s = (K - 1 - k) * dil
                z2 = z2 + jnp.dot(hbuf[Hp - s:Hp - s + TL, :], w2r[k],
                                  preferred_element_type=jnp.float32)
            y2 = z2 + b2[...]

            # relu(relu(conv2_out) + residual)
            cur = jnp.maximum(jnp.maximum(y2, 0.0) + res, 0.0)

        o_ref[0] = cur.astype(o_ref.dtype)

    return kernel, n_w


# ---------------------------------------------------------------------------
# Host-side wrapper
# ---------------------------------------------------------------------------
def tcn_forward(x, params_list, kernel_size, channels_last=False, time_tile=256):
    """TemporalConvNetwork.forward (eval mode; dropout == identity).

    channels_last=False: x is (B, C, L) (PyTorch Conv1d convention); output too.
    channels_last=True : x is (B, L, C); output too.
    """
    t = x if channels_last else jnp.swapaxes(x, 1, 2)       # -> (B, L, C)
    B, L, c_in = t.shape
    K = int(kernel_size)

    # ---- per-layer static config + padded / fused bf16 weights ---------------
    cfgs, packed = [], []
    cin, cin_p = c_in, _rup(c_in, LANE)
    for i, (w1, b1, w2, b2, wd, bd) in enumerate(params_list):
        dil = 2 ** i
        H = (K - 1) * dil
        cout = int(w1.shape[-1])
        cout_p = _rup(cout, LANE)
        has_ds = wd is not None

        w1p = jnp.zeros((K, cin_p, cout_p), jnp.float32).at[:, :cin, :cout].set(w1)
        layer = []
        if K > 1:
            layer.append(w1p[:K - 1].astype(jnp.bfloat16))           # w1_rest
        w1_last = w1p[K - 1]                                          # shift-0 tap
        if has_ds:
            wdp = jnp.zeros((cin_p, cout_p), jnp.float32).at[:cin, :cout].set(wd)
            w1_last = jnp.concatenate([w1_last, wdp], axis=1)         # fuse 1x1 ds
        layer.append(w1_last.astype(jnp.bfloat16))                    # w1_last
        layer.append(jnp.zeros((1, cout_p), jnp.float32).at[0, :cout].set(b1))
        if has_ds:
            layer.append(jnp.zeros((1, cout_p), jnp.float32).at[0, :cout].set(bd))

        w2p = jnp.zeros((K, cout_p, cout_p), jnp.float32).at[:, :cout, :cout].set(w2)
        if K > 1:
            layer.append(w2p[:K - 1].astype(jnp.bfloat16))            # w2_rest
        layer.append(w2p[K - 1].astype(jnp.bfloat16))                 # w2_last
        layer.append(jnp.zeros((1, cout_p), jnp.float32).at[0, :cout].set(b2))

        packed += layer
        cfgs.append(dict(K=K, dil=dil, H=H, Hp=_rup(H, SUBLANE),
                         cin_p=cin_p, cout_p=cout_p, has_ds=has_ds, cout=cout))
        cin, cin_p = cout, cout_p

    # ---- time tiling (no TL >= h_max clamp: history carry handles TL < H) ----
    TL = max(SUBLANE, min(_rup(time_tile, SUBLANE), _rup(L, SUBLANE)))
    Lp = _rup(L, TL)
    NT = Lp // TL

    cin0_p = cfgs[0]["cin_p"]
    cout_last = cfgs[-1]["cout"]
    cout_last_p = cfgs[-1]["cout_p"]

    # pad input to lane-dense channels and TL-divisible time
    xin = jnp.zeros((B, Lp, cin0_p), t.dtype).at[:, :L, :c_in].set(t)

    kernel, n_w = _make_kernel(cfgs, TL)
    assert n_w == len(packed)

    scratch_shapes = []
    for c in cfgs:
        scratch_shapes.append(pltpu.VMEM((c["Hp"] + TL, c["cin_p"]), jnp.bfloat16))
        scratch_shapes.append(pltpu.VMEM((c["Hp"] + TL, c["cout_p"]), jnp.bfloat16))

    out_shape = jax.ShapeDtypeStruct((B, Lp, cout_last_p), t.dtype)
    out_spec = pl.BlockSpec((1, TL, cout_last_p), lambda b, l: (b, l, 0))

    def build(use_buffered):
        in_specs = [pl.BlockSpec((1, TL, cin0_p), lambda b, l: (b, l, 0))]
        for w in packed:   # grid-invariant weights: full-array blocks
            idx = (lambda b, l, _nd=w.ndim: (0,) * _nd)
            if use_buffered:
                spec = pl.BlockSpec(w.shape, idx, pipeline_mode=pl.Buffered(1))
            else:
                spec = pl.BlockSpec(w.shape, idx)
            in_specs.append(spec)
        return pl.pallas_call(
            kernel,
            out_shape=out_shape,
            grid_spec=pltpu.PrefetchScalarGridSpec(
                num_scalar_prefetch=0,
                grid=(B, NT),
                in_specs=in_specs,
                out_specs=out_spec,
                scratch_shapes=scratch_shapes,
            ),
            compiler_params=pltpu.CompilerParams(
                dimension_semantics=("parallel", "arbitrary"),
                vmem_limit_bytes=40 * 1024 * 1024,
            ),
        )

    try:
        out = build(True)(xin, *packed)
    except Exception:
        # Fallback if this JAX build rejects single-buffered pipeline_mode.
        out = build(False)(xin, *packed)

    out = out[:, :L, :cout_last]
    return out if channels_last else jnp.swapaxes(out, 1, 2)


# ---------------------------------------------------------------------------
# Deterministic parameter init (mirrors TemporalBlock.__init__ shapes)
# ---------------------------------------------------------------------------
def init_tcn_params(key, in_channels, out_channels_list, kernel_size):
    params = []
    for i, cout in enumerate(out_channels_list):
        cin = in_channels if i == 0 else out_channels_list[i - 1]
        key, k1, k2, k3, k4, k5, k6 = jax.random.split(key, 7)
        # weight_norm(Conv1d): effective weight = g * v / ||v|| with g = ||v||
        # per output channel -> identical to v at init; computed explicitly.
        v1 = 0.01 * jax.random.normal(k1, (kernel_size, cin, cout), jnp.float32)
        n1 = jnp.sqrt(jnp.sum(v1 * v1, axis=(0, 1), keepdims=True))
        w1 = n1 * v1 / (n1 + 1e-12)
        b1 = 0.1 * jax.random.normal(k2, (cout,), jnp.float32)

        v2 = 0.01 * jax.random.normal(k3, (kernel_size, cout, cout), jnp.float32)
        n2 = jnp.sqrt(jnp.sum(v2 * v2, axis=(0, 1), keepdims=True))
        w2 = n2 * v2 / (n2 + 1e-12)
        b2 = 0.1 * jax.random.normal(k4, (cout,), jnp.float32)

        if cin != cout:  # downsample = Conv1d(cin, cout, 1)
            wd = 0.01 * jax.random.normal(k5, (cin, cout), jnp.float32)
            bd = 0.1 * jax.random.normal(k6, (cout,), jnp.float32)
        else:
            wd, bd = None, None
        params.append((w1, b1, w2, b2, wd, bd))
    return params


# ---------------------------------------------------------------------------
# Pure-JAX reference (for numerical check)
# ---------------------------------------------------------------------------
def _ref_causal_conv(x_ncl, w_kic, b, dilation):
    w_oik = jnp.transpose(w_kic, (2, 1, 0))              # (Cout, Cin, K)
    pad = (w_oik.shape[-1] - 1) * dilation
    y = jax.lax.conv_general_dilated(
        x_ncl, w_oik, window_strides=(1,), padding=[(pad, pad)],
        rhs_dilation=(dilation,), dimension_numbers=("NCH", "OIH", "NCH"))
    if pad > 0:
        y = y[:, :, :-pad]                                # Chomp1d
    return y + b[None, :, None]


def _ref_block(x_ncl, params, dilation):
    w1, b1, w2, b2, wd, bd = params
    y1 = jnp.maximum(_ref_causal_conv(x_ncl, w1, b1, dilation), 0.0)
    y2 = jnp.maximum(_ref_causal_conv(y1, w2, b2, dilation), 0.0)
    if wd is None:
        res = x_ncl
    else:
        res = jnp.einsum("bcl,cd->bdl", x_ncl, wd) + bd[None, :, None]
    return jnp.maximum(y2 + res, 0.0)


def tcn_reference(x_ncl, params_list):
    t = x_ncl
    for i, p in enumerate(params_list):
        t = _ref_block(t, p, 2 ** i)
    return t


# ---------------------------------------------------------------------------
if __name__ == "__main__":
    key = jax.random.PRNGKey(0)
    kx, kp, kx2, kp2 = jax.random.split(key, 4)

    # ---- (1) two TemporalBlocks, K=2, dilations 1/2 --------------------------
    B, C_IN, L = 2, 4, 16
    OUT_CHANNELS = [8, 8]
    KSIZE = 2
    x = jax.random.normal(kx, (B, C_IN, L), jnp.float32)   # PyTorch NCL input
    params = init_tcn_params(kp, C_IN, OUT_CHANNELS, KSIZE)
    ref = tcn_reference(x, params)

    # (a) time-tiled path: TL=8 -> 2 time tiles, exercises the carried history.
    out_tiled = jax.block_until_ready(
        tcn_forward(x, params, KSIZE, channels_last=False, time_tile=8))
    assert out_tiled.shape == (B, OUT_CHANNELS[-1], L), out_tiled.shape
    np.testing.assert_allclose(np.asarray(out_tiled), np.asarray(ref),
                               rtol=5e-2, atol=5e-3)

    # (b) single-tile path (whole L per grid step).
    out_full = jax.block_until_ready(
        tcn_forward(x, params, KSIZE, channels_last=False, time_tile=256))
    np.testing.assert_allclose(np.asarray(out_full), np.asarray(ref),
                               rtol=5e-2, atol=5e-3)

    # ---- (2) deeper stack, K=3, dilations up to 8: exercises TL < history ----
    B2, C2, L2 = 1, 4, 40
    OUT2 = [8, 8, 8, 8]
    K2 = 3
    x2 = jax.random.normal(kx2, (B2, C2, L2), jnp.float32)
    params2 = init_tcn_params(kp2, C2, OUT2, K2)
    ref2 = tcn_reference(x2, params2)
    out2 = jax.block_until_ready(
        tcn_forward(x2, params2, K2, channels_last=False, time_tile=8))
    np.testing.assert_allclose(np.asarray(out2), np.asarray(ref2),
                               rtol=5e-2, atol=5e-3)

    print("KERNEL_OK")
</pallas_src>

<mosaic_0001>
module attributes {stable_mosaic.version = 11 : i64} {
  func.func @kernel(%arg0: i32, %arg1: i32, %arg2: memref<1x8x128xf32, #tpu.memory_space<vmem>>, %arg3: memref<1x128x128xbf16, #tpu.memory_space<vmem>>, %arg4: memref<128x256xbf16, #tpu.memory_space<vmem>>, %arg5: memref<1x128xf32, #tpu.memory_space<vmem>>, %arg6: memref<1x128xf32, #tpu.memory_space<vmem>>, %arg7: memref<1x128x128xbf16, #tpu.memory_space<vmem>>, %arg8: memref<128x128xbf16, #tpu.memory_space<vmem>>, %arg9: memref<1x128xf32, #tpu.memory_space<vmem>>, %arg10: memref<1x128x128xbf16, #tpu.memory_space<vmem>>, %arg11: memref<128x128xbf16, #tpu.memory_space<vmem>>, %arg12: memref<1x128xf32, #tpu.memory_space<vmem>>, %arg13: memref<1x128x128xbf16, #tpu.memory_space<vmem>>, %arg14: memref<128x128xbf16, #tpu.memory_space<vmem>>, %arg15: memref<1x128xf32, #tpu.memory_space<vmem>>, %arg16: memref<1x8x128xf32, #tpu.memory_space<vmem>>, %arg17: memref<16x128xbf16, #tpu.memory_space<vmem>>, %arg18: memref<16x128xbf16, #tpu.memory_space<vmem>>, %arg19: memref<16x128xbf16, #tpu.memory_space<vmem>>, %arg20: memref<16x128xbf16, #tpu.memory_space<vmem>>) attributes {dimension_semantics = [#tpu.dimension_semantics<parallel>, #tpu.dimension_semantics<arbitrary>], iteration_bounds = array<i64: 2, 2>, scalar_prefetch = 0 : i64, scratch_operands = 4 : i64, tpu.core_type = #tpu.core_type<tc>, window_params = [{transform_indices = @transform_0, window_bounds = array<i64: 1, 8, 128>}, {pipeline_mode = #tpu.pipeline_mode<synchronous>, transform_indices = @transform_1, window_bounds = array<i64: 1, 128, 128>}, {pipeline_mode = #tpu.pipeline_mode<synchronous>, transform_indices = @transform_2, window_bounds = array<i64: 128, 256>}, {pipeline_mode = #tpu.pipeline_mode<synchronous>, transform_indices = @transform_3, window_bounds = array<i64: 1, 128>}, {pipeline_mode = #tpu.pipeline_mode<synchronous>, transform_indices = @transform_4, window_bounds = array<i64: 1, 128>}, {pipeline_mode = #tpu.pipeline_mode<synchronous>, transform_indices = @transform_5, window_bounds = array<i64: 1, 128, 128>}, {pipeline_mode = #tpu.pipeline_mode<synchronous>, transform_indices = @transform_6, window_bounds = array<i64: 128, 128>}, {pipeline_mode = #tpu.pipeline_mode<synchronous>, transform_indices = @transform_7, window_bounds = array<i64: 1, 128>}, {pipeline_mode = #tpu.pipeline_mode<synchronous>, transform_indices = @transform_8, window_bounds = array<i64: 1, 128, 128>}, {pipeline_mode = #tpu.pipeline_mode<synchronous>, transform_indices = @transform_9, window_bounds = array<i64: 128, 128>}, {pipeline_mode = #tpu.pipeline_mode<synchronous>, transform_indices = @transform_10, window_bounds = array<i64: 1, 128>}, {pipeline_mode = #tpu.pipeline_mode<synchronous>, transform_indices = @transform_11, window_bounds = array<i64: 1, 128, 128>}, {pipeline_mode = #tpu.pipeline_mode<synchronous>, transform_indices = @transform_12, window_bounds = array<i64: 128, 128>}, {pipeline_mode = #tpu.pipeline_mode<synchronous>, transform_indices = @transform_13, window_bounds = array<i64: 1, 128>}, {transform_indices = @transform_14, window_bounds = array<i64: 1, 8, 128>}]} {
    %c0 = arith.constant 0 : index
    %c0_0 = arith.constant 0 : index
    %c0_1 = arith.constant 0 : index
    %0 = vector.load %arg2[%c0, %c0_0, %c0_1] : memref<1x8x128xf32, #tpu.memory_space<vmem>>, vector<1x8x128xf32>
    %1 = vector.shape_cast %0 : vector<1x8x128xf32> to vector<8x128xf32>
    %c0_i32 = arith.constant 0 : i32
    %2 = arith.cmpi eq, %arg1, %c0_i32 : i32
    %3 = arith.extui %2 : i1 to i32
    %c0_i32_2 = arith.constant 0 : i32
    %4 = arith.cmpi ne, %3, %c0_i32_2 : i32
    scf.if %4 {
      %cst_68 = arith.constant 0.000000e+00 : bf16
      %84 = vector.broadcast %cst_68 : bf16 to vector<1x128xbf16>
      %c7_69 = arith.constant 7 : index
      %c0_70 = arith.constant 0 : index
      %85 = vector.load %arg17[%c7_69, %c0_70] : memref<16x128xbf16, #tpu.memory_space<vmem>>, vector<1x128xbf16>
      tpu.vector_store %arg17[%c7_69, %c0_70], %84 {strides = array<i32>} : memref<16x128xbf16, #tpu.memory_space<vmem>>, vector<1x128xbf16>,
      %cst_71 = arith.constant 0.000000e+00 : bf16
      %86 = vector.broadcast %cst_71 : bf16 to vector<1x128xbf16>
      %c7_72 = arith.constant 7 : index
      %c0_73 = arith.constant 0 : index
      %87 = vector.load %arg18[%c7_72, %c0_73] : memref<16x128xbf16, #tpu.memory_space<vmem>>, vector<1x128xbf16>
      tpu.vector_store %arg18[%c7_72, %c0_73], %86 {strides = array<i32>} : memref<16x128xbf16, #tpu.memory_space<vmem>>, vector<1x128xbf16>,
    } else {
    }
    %c0_i32_3 = arith.constant 0 : i32
    %5 = arith.cmpi sgt, %arg1, %c0_i32_3 : i32
    %6 = arith.extui %5 : i1 to i32
    %c0_i32_4 = arith.constant 0 : i32
    %7 = arith.cmpi ne, %6, %c0_i32_4 : i32
    scf.if %7 {
      %c15 = arith.constant 15 : index
      %c0_68 = arith.constant 0 : index
      %84 = vector.load %arg17[%c15, %c0_68] : memref<16x128xbf16, #tpu.memory_space<vmem>>, vector<1x128xbf16>
      %c15_69 = arith.constant 15 : index
      %c0_70 = arith.constant 0 : index
      %85 = vector.load %arg18[%c15_69, %c0_70] : memref<16x128xbf16, #tpu.memory_space<vmem>>, vector<1x128xbf16>
      %c7_71 = arith.constant 7 : index
      %c0_72 = arith.constant 0 : index
      %86 = vector.load %arg17[%c7_71, %c0_72] : memref<16x128xbf16, #tpu.memory_space<vmem>>, vector<1x128xbf16>
      tpu.vector_store %arg17[%c7_71, %c0_72], %84 {strides = array<i32>} : memref<16x128xbf16, #tpu.memory_space<vmem>>, vector<1x128xbf16>,
      %c7_73 = arith.constant 7 : index
      %c0_74 = arith.constant 0 : index
      %87 = vector.load %arg18[%c7_73, %c0_74] : memref<16x128xbf16, #tpu.memory_space<vmem>>, vector<1x128xbf16>
      tpu.vector_store %arg18[%c7_73, %c0_74], %85 {strides = array<i32>} : memref<16x128xbf16, #tpu.memory_space<vmem>>, vector<1x128xbf16>,
    } else {
    }
    %8 = arith.truncf %1 : vector<8x128xf32> to vector<8x128xbf16>
    %c8 = arith.constant 8 : index
    %c0_5 = arith.constant 0 : index
    %9 = vector.load %arg17[%c8, %c0_5] : memref<16x128xbf16, #tpu.memory_space<vmem>>, vector<8x128xbf16>
    tpu.vector_store %arg17[%c8, %c0_5], %8 {strides = array<i32>} : memref<16x128xbf16, #tpu.memory_space<vmem>>, vector<8x128xbf16>,
    %c0_6 = arith.constant 0 : index
    %c0_7 = arith.constant 0 : index
    %10 = vector.load %arg4[%c0_6, %c0_7] : memref<128x256xbf16, #tpu.memory_space<vmem>>, vector<128x256xbf16>
    %cst = arith.constant dense<0.000000e+00> : vector<8x256xf32>
    %11 = tpu.matmul %8, %10, %cst {dimension_numbers = #tpu.dot_dimension_numbers<[1], [0], [0], [1], [0, 0, 1, 1], [], []>} : vector<8x128xbf16>, vector<128x256xbf16>, vector<8x256xf32> -> vector<8x256xf32>
    %12 = vector.extract_strided_slice %11 {offsets = [0, 128], sizes = [8, 128], strides = [1, 1]} : vector<8x256xf32> to vector<8x128xf32>
    %c0_8 = arith.constant 0 : index
    %c0_9 = arith.constant 0 : index
    %13 = vector.load %arg6[%c0_8, %c0_9] : memref<1x128xf32, #tpu.memory_space<vmem>>, vector<1x128xf32>
    %14 = vector.broadcast %13 : vector<1x128xf32> to vector<8x128xf32>
    %15 = arith.addf %12, %14 : vector<8x128xf32>
    %16 = vector.extract_strided_slice %11 {offsets = [0, 0], sizes = [8, 128], strides = [1, 1]} : vector<8x256xf32> to vector<8x128xf32>
    %c7 = arith.constant 7 : index
    %c0_10 = arith.constant 0 : index
    %17 = vector.load %arg17[%c7, %c0_10] : memref<16x128xbf16, #tpu.memory_space<vmem>>, vector<8x128xbf16>
    %c0_11 = arith.constant 0 : index
    %c0_12 = arith.constant 0 : index
    %c0_13 = arith.constant 0 : index
    %18 = vector.load %arg3[%c0_11, %c0_12, %c0_13] : memref<1x128x128xbf16, #tpu.memory_space<vmem>>, vector<1x128x128xbf16>
    %19 = vector.shape_cast %18 : vector<1x128x128xbf16> to vector<128x128xbf16>
    %cst_14 = arith.constant dense<0.000000e+00> : vector<8x128xf32>
    %20 = tpu.matmul %17, %19, %cst_14 {dimension_numbers = #tpu.dot_dimension_numbers<[1], [0], [0], [1], [0, 0, 1, 1], [], []>} : vector<8x128xbf16>, vector<128x128xbf16>, vector<8x128xf32> -> vector<8x128xf32>
    %21 = arith.addf %16, %20 : vector<8x128xf32>
    %c0_15 = arith.constant 0 : index
    %c0_16 = arith.constant 0 : index
    %22 = vector.load %arg5[%c0_15, %c0_16] : memref<1x128xf32, #tpu.memory_space<vmem>>, vector<1x128xf32>
    %23 = vector.broadcast %22 : vector<1x128xf32> to vector<8x128xf32>
    %24 = arith.addf %21, %23 : vector<8x128xf32>
    %cst_17 = arith.constant 0.000000e+00 : f32
    %25 = vector.broadcast %cst_17 : f32 to vector<8x128xf32>
    %26 = arith.maximumf %24, %25 : vector<8x128xf32>
    %27 = arith.truncf %26 : vector<8x128xf32> to vector<8x128xbf16>
    %c8_18 = arith.constant 8 : index
    %c0_19 = arith.constant 0 : index
    %28 = vector.load %arg18[%c8_18, %c0_19] : memref<16x128xbf16, #tpu.memory_space<vmem>>, vector<8x128xbf16>
    tpu.vector_store %arg18[%c8_18, %c0_19], %27 {strides = array<i32>} : memref<16x128xbf16, #tpu.memory_space<vmem>>, vector<8x128xbf16>,
    %c0_20 = arith.constant 0 : index
    %c0_21 = arith.constant 0 : index
    %29 = vector.load %arg8[%c0_20, %c0_21] : memref<128x128xbf16, #tpu.memory_space<vmem>>, vector<128x128xbf16>
    %cst_22 = arith.constant dense<0.000000e+00> : vector<8x128xf32>
    %30 = tpu.matmul %27, %29, %cst_22 {dimension_numbers = #tpu.dot_dimension_numbers<[1], [0], [0], [1], [0, 0, 1, 1], [], []>} : vector<8x128xbf16>, vector<128x128xbf16>, vector<8x128xf32> -> vector<8x128xf32>
    %c7_23 = arith.constant 7 : index
    %c0_24 = arith.constant 0 : index
    %31 = vector.load %arg18[%c7_23, %c0_24] : memref<16x128xbf16, #tpu.memory_space<vmem>>, vector<8x128xbf16>
    %c0_25 = arith.constant 0 : index
    %c0_26 = arith.constant 0 : index
    %c0_27 = arith.constant 0 : index
    %32 = vector.load %arg7[%c0_25, %c0_26, %c0_27] : memref<1x128x128xbf16, #tpu.memory_space<vmem>>, vector<1x128x128xbf16>
    %33 = vector.shape_cast %32 : vector<1x128x128xbf16> to vector<128x128xbf16>
    %cst_28 = arith.constant dense<0.000000e+00> : vector<8x128xf32>
    %34 = tpu.matmul %31, %33, %cst_28 {dimension_numbers = #tpu.dot_dimension_numbers<[1], [0], [0], [1], [0, 0, 1, 1], [], []>} : vector<8x128xbf16>, vector<128x128xbf16>, vector<8x128xf32> -> vector<8x128xf32>
    %35 = arith.addf %30, %34 : vector<8x128xf32>
    %c0_29 = arith.constant 0 : index
    %c0_30 = arith.constant 0 : index
    %36 = vector.load %arg9[%c0_29, %c0_30] : memref<1x128xf32, #tpu.memory_space<vmem>>, vector<1x128xf32>
    %37 = vector.broadcast %36 : vector<1x128xf32> to vector<8x128xf32>
    %38 = arith.addf %35, %37 : vector<8x128xf32>
    %cst_31 = arith.constant 0.000000e+00 : f32
    %39 = vector.broadcast %cst_31 : f32 to vector<8x128xf32>
    %40 = arith.maximumf %38, %39 : vector<8x128xf32>
    %41 = arith.addf %40, %15 : vector<8x128xf32>
    %cst_32 = arith.constant 0.000000e+00 : f32
    %42 = vector.broadcast %cst_32 : f32 to vector<8x128xf32>
    %43 = arith.maximumf %41, %42 : vector<8x128xf32>
    %c0_i32_33 = arith.constant 0 : i32
    %44 = arith.cmpi eq, %arg1, %c0_i32_33 : i32
    %45 = arith.extui %44 : i1 to i32
    %c0_i32_34 = arith.constant 0 : i32
    %46 = arith.cmpi ne, %45, %c0_i32_34 : i32
    scf.if %46 {
      %cst_68 = arith.constant 0.000000e+00 : bf16
      %84 = vector.broadcast %cst_68 : bf16 to vector<2x128xbf16>
      %c6_69 = arith.constant 6 : index
      %c0_70 = arith.constant 0 : index
      %85 = vector.load %arg19[%c6_69, %c0_70] : memref<16x128xbf16, #tpu.memory_space<vmem>>, vector<2x128xbf16>
      tpu.vector_store %arg19[%c6_69, %c0_70], %84 {strides = array<i32>} : memref<16x128xbf16, #tpu.memory_space<vmem>>, vector<2x128xbf16>,
      %cst_71 = arith.constant 0.000000e+00 : bf16
      %86 = vector.broadcast %cst_71 : bf16 to vector<2x128xbf16>
      %c6_72 = arith.constant 6 : index
      %c0_73 = arith.constant 0 : index
      %87 = vector.load %arg20[%c6_72, %c0_73] : memref<16x128xbf16, #tpu.memory_space<vmem>>, vector<2x128xbf16>
      tpu.vector_store %arg20[%c6_72, %c0_73], %86 {strides = array<i32>} : memref<16x128xbf16, #tpu.memory_space<vmem>>, vector<2x128xbf16>,
    } else {
    }
    %c0_i32_35 = arith.constant 0 : i32
    %47 = arith.cmpi sgt, %arg1, %c0_i32_35 : i32
    %48 = arith.extui %47 : i1 to i32
    %c0_i32_36 = arith.constant 0 : i32
    %49 = arith.cmpi ne, %48, %c0_i32_36 : i32
    scf.if %49 {
      %c14 = arith.constant 14 : index
      %c0_68 = arith.constant 0 : index
      %84 = vector.load %arg19[%c14, %c0_68] : memref<16x128xbf16, #tpu.memory_space<vmem>>, vector<2x128xbf16>
      %c14_69 = arith.constant 14 : index
      %c0_70 = arith.constant 0 : index
      %85 = vector.load %arg20[%c14_69, %c0_70] : memref<16x128xbf16, #tpu.memory_space<vmem>>, vector<2x128xbf16>
      %c6_71 = arith.constant 6 : index
      %c0_72 = arith.constant 0 : index
      %86 = vector.load %arg19[%c6_71, %c0_72] : memref<16x128xbf16, #tpu.memory_space<vmem>>, vector<2x128xbf16>
      tpu.vector_store %arg19[%c6_71, %c0_72], %84 {strides = array<i32>} : memref<16x128xbf16, #tpu.memory_space<vmem>>, vector<2x128xbf16>,
      %c6_73 = arith.constant 6 : index
      %c0_74 = arith.constant 0 : index
      %87 = vector.load %arg20[%c6_73, %c0_74] : memref<16x128xbf16, #tpu.memory_space<vmem>>, vector<2x128xbf16>
      tpu.vector_store %arg20[%c6_73, %c0_74], %85 {strides = array<i32>} : memref<16x128xbf16, #tpu.memory_space<vmem>>, vector<2x128xbf16>,
    } else {
    }
    %50 = arith.truncf %43 : vector<8x128xf32> to vector<8x128xbf16>
    %c8_37 = arith.constant 8 : index
    %c0_38 = arith.constant 0 : index
    %51 = vector.load %arg19[%c8_37, %c0_38] : memref<16x128xbf16, #tpu.memory_space<vmem>>, vector<8x128xbf16>
    tpu.vector_store %arg19[%c8_37, %c0_38], %50 {strides = array<i32>} : memref<16x128xbf16, #tpu.memory_space<vmem>>, vector<8x128xbf16>,
    %c0_39 = arith.constant 0 : index
    %c0_40 = arith.constant 0 : index
    %52 = vector.load %arg11[%c0_39, %c0_40] : memref<128x128xbf16, #tpu.memory_space<vmem>>, vector<128x128xbf16>
    %cst_41 = arith.constant dense<0.000000e+00> : vector<8x128xf32>
    %53 = tpu.matmul %50, %52, %cst_41 {dimension_numbers = #tpu.dot_dimension_numbers<[1], [0], [0], [1], [0, 0, 1, 1], [], []>} : vector<8x128xbf16>, vector<128x128xbf16>, vector<8x128xf32> -> vector<8x128xf32>
    %c6 = arith.constant 6 : index
    %c0_42 = arith.constant 0 : index
    %54 = vector.load %arg19[%c6, %c0_42] : memref<16x128xbf16, #tpu.memory_space<vmem>>, vector<8x128xbf16>
    %c0_43 = arith.constant 0 : index
    %c0_44 = arith.constant 0 : index
    %c0_45 = arith.constant 0 : index
    %55 = vector.load %arg10[%c0_43, %c0_44, %c0_45] : memref<1x128x128xbf16, #tpu.memory_space<vmem>>, vector<1x128x128xbf16>
    %56 = vector.shape_cast %55 : vector<1x128x128xbf16> to vector<128x128xbf16>
    %cst_46 = arith.constant dense<0.000000e+00> : vector<8x128xf32>
    %57 = tpu.matmul %54, %56, %cst_46 {dimension_numbers = #tpu.dot_dimension_numbers<[1], [0], [0], [1], [0, 0, 1, 1], [], []>} : vector<8x128xbf16>, vector<128x128xbf16>, vector<8x128xf32> -> vector<8x128xf32>
    %58 = arith.addf %53, %57 : vector<8x128xf32>
    %c0_47 = arith.constant 0 : index
    %c0_48 = arith.constant 0 : index
    %59 = vector.load %arg12[%c0_47, %c0_48] : memref<1x128xf32, #tpu.memory_space<vmem>>, vector<1x128xf32>
    %60 = vector.broadcast %59 : vector<1x128xf32> to vector<8x128xf32>
    %61 = arith.addf %58, %60 : vector<8x128xf32>
    %cst_49 = arith.constant 0.000000e+00 : f32
    %62 = vector.broadcast %cst_49 : f32 to vector<8x128xf32>
    %63 = arith.maximumf %61, %62 : vector<8x128xf32>
    %64 = arith.truncf %63 : vector<8x128xf32> to vector<8x128xbf16>
    %c8_50 = arith.constant 8 : index
    %c0_51 = arith.constant 0 : index
    %65 = vector.load %arg20[%c8_50, %c0_51] : memref<16x128xbf16, #tpu.memory_space<vmem>>, vector<8x128xbf16>
    tpu.vector_store %arg20[%c8_50, %c0_51], %64 {strides = array<i32>} : memref<16x128xbf16, #tpu.memory_space<vmem>>, vector<8x128xbf16>,
    %c0_52 = arith.constant 0 : index
    %c0_53 = arith.constant 0 : index
    %66 = vector.load %arg14[%c0_52, %c0_53] : memref<128x128xbf16, #tpu.memory_space<vmem>>, vector<128x128xbf16>
    %cst_54 = arith.constant dense<0.000000e+00> : vector<8x128xf32>
    %67 = tpu.matmul %64, %66, %cst_54 {dimension_numbers = #tpu.dot_dimension_numbers<[1], [0], [0], [1], [0, 0, 1, 1], [], []>} : vector<8x128xbf16>, vector<128x128xbf16>, vector<8x128xf32> -> vector<8x128xf32>
    %c6_55 = arith.constant 6 : index
    %c0_56 = arith.constant 0 : index
    %68 = vector.load %arg20[%c6_55, %c0_56] : memref<16x128xbf16, #tpu.memory_space<vmem>>, vector<8x128xbf16>
    %c0_57 = arith.constant 0 : index
    %c0_58 = arith.constant 0 : index
    %c0_59 = arith.constant 0 : index
    %69 = vector.load %arg13[%c0_57, %c0_58, %c0_59] : memref<1x128x128xbf16, #tpu.memory_space<vmem>>, vector<1x128x128xbf16>
    %70 = vector.shape_cast %69 : vector<1x128x128xbf16> to vector<128x128xbf16>
    %cst_60 = arith.constant dense<0.000000e+00> : vector<8x128xf32>
    %71 = tpu.matmul %68, %70, %cst_60 {dimension_numbers = #tpu.dot_dimension_numbers<[1], [0], [0], [1], [0, 0, 1, 1], [], []>} : vector<8x128xbf16>, vector<128x128xbf16>, vector<8x128xf32> -> vector<8x128xf32>
    %72 = arith.addf %67, %71 : vector<8x128xf32>
    %c0_61 = arith.constant 0 : index
    %c0_62 = arith.constant 0 : index
    %73 = vector.load %arg15[%c0_61, %c0_62] : memref<1x128xf32, #tpu.memory_space<vmem>>, vector<1x128xf32>
    %74 = vector.broadcast %73 : vector<1x128xf32> to vector<8x128xf32>
    %75 = arith.addf %72, %74 : vector<8x128xf32>
    %cst_63 = arith.constant 0.000000e+00 : f32
    %76 = vector.broadcast %cst_63 : f32 to vector<8x128xf32>
    %77 = arith.maximumf %75, %76 : vector<8x128xf32>
    %78 = arith.addf %77, %43 : vector<8x128xf32>
    %cst_64 = arith.constant 0.000000e+00 : f32
    %79 = vector.broadcast %cst_64 : f32 to vector<8x128xf32>
    %80 = arith.maximumf %78, %79 : vector<8x128xf32>
    %c0_65 = arith.constant 0 : index
    %c0_66 = arith.constant 0 : index
    %c0_67 = arith.constant 0 : index
    %81 = vector.load %arg16[%c0_65, %c0_66, %c0_67] : memref<1x8x128xf32, #tpu.memory_space<vmem>>, vector<1x8x128xf32>
    %82 = vector.shape_cast %81 : vector<1x8x128xf32> to vector<8x128xf32>
    %83 = vector.shape_cast %80 : vector<8x128xf32> to vector<1x8x128xf32>
    tpu.vector_store %arg16[%c0_65, %c0_66, %c0_67], %83 {strides = array<i32>} : memref<1x8x128xf32, #tpu.memory_space<vmem>>, vector<1x8x128xf32>,
    return
  }
  func.func @transform_0(%arg0: i32, %arg1: i32) -> (i32, i32, i32) {
    %c0_i32 = arith.constant 0 : i32
    %c0_i32_0 = arith.constant 0 : i32
    return %arg0, %arg1, %c0_i32 : i32, i32, i32
  }
  func.func @transform_1(%arg0: i32, %arg1: i32) -> (i32, i32, i32) {
    %c0_i32 = arith.constant 0 : i32
    %c0_i32_0 = arith.constant 0 : i32
    %c0_i32_1 = arith.constant 0 : i32
    %c0_i32_2 = arith.constant 0 : i32
    return %c0_i32, %c0_i32_0, %c0_i32_1 : i32, i32, i32
  }
  func.func @transform_2(%arg0: i32, %arg1: i32) -> (i32, i32) {
    %c0_i32 = arith.constant 0 : i32
    %c0_i32_0 = arith.constant 0 : i32
    %c0_i32_1 = arith.constant 0 : i32
    return %c0_i32, %c0_i32_0 : i32, i32
  }
  func.func @transform_3(%arg0: i32, %arg1: i32) -> (i32, i32) {
    %c0_i32 = arith.constant 0 : i32
    %c0_i32_0 = arith.constant 0 : i32
    %c0_i32_1 = arith.constant 0 : i32
    return %c0_i32, %c0_i32_0 : i32, i32
  }
  func.func @transform_4(%arg0: i32, %arg1: i32) -> (i32, i32) {
    %c0_i32 = arith.constant 0 : i32
    %c0_i32_0 = arith.constant 0 : i32
    %c0_i32_1 = arith.constant 0 : i32
    return %c0_i32, %c0_i32_0 : i32, i32
  }
  func.func @transform_5(%arg0: i32, %arg1: i32) -> (i32, i32, i32) {
    %c0_i32 = arith.constant 0 : i32
    %c0_i32_0 = arith.constant 0 : i32
    %c0_i32_1 = arith.constant 0 : i32
    %c0_i32_2 = arith.constant 0 : i32
    return %c0_i32, %c0_i32_0, %c0_i32_1 : i32, i32, i32
  }
  func.func @transform_6(%arg0: i32, %arg1: i32) -> (i32, i32) {
    %c0_i32 = arith.constant 0 : i32
    %c0_i32_0 = arith.constant 0 : i32
    %c0_i32_1 = arith.constant 0 : i32
    return %c0_i32, %c0_i32_0 : i32, i32
  }
  func.func @transform_7(%arg0: i32, %arg1: i32) -> (i32, i32) {
    %c0_i32 = arith.constant 0 : i32
    %c0_i32_0 = arith.constant 0 : i32
    %c0_i32_1 = arith.constant 0 : i32
    return %c0_i32, %c0_i32_0 : i32, i32
  }
  func.func @transform_8(%arg0: i32, %arg1: i32) -> (i32, i32, i32) {
    %c0_i32 = arith.constant 0 : i32
    %c0_i32_0 = arith.constant 0 : i32
    %c0_i32_1 = arith.constant 0 : i32
    %c0_i32_2 = arith.constant 0 : i32
    return %c0_i32, %c0_i32_0, %c0_i32_1 : i32, i32, i32
  }
  func.func @transform_9(%arg0: i32, %arg1: i32) -> (i32, i32) {
    %c0_i32 = arith.constant 0 : i32
    %c0_i32_0 = arith.constant 0 : i32
    %c0_i32_1 = arith.constant 0 : i32
    return %c0_i32, %c0_i32_0 : i32, i32
  }
  func.func @transform_10(%arg0: i32, %arg1: i32) -> (i32, i32) {
    %c0_i32 = arith.constant 0 : i32
    %c0_i32_0 = arith.constant 0 : i32
    %c0_i32_1 = arith.constant 0 : i32
    return %c0_i32, %c0_i32_0 : i32, i32
  }
  func.func @transform_11(%arg0: i32, %arg1: i32) -> (i32, i32, i32) {
    %c0_i32 = arith.constant 0 : i32
    %c0_i32_0 = arith.constant 0 : i32
    %c0_i32_1 = arith.constant 0 : i32
    %c0_i32_2 = arith.constant 0 : i32
    return %c0_i32, %c0_i32_0, %c0_i32_1 : i32, i32, i32
  }
  func.func @transform_12(%arg0: i32, %arg1: i32) -> (i32, i32) {
    %c0_i32 = arith.constant 0 : i32
    %c0_i32_0 = arith.constant 0 : i32
    %c0_i32_1 = arith.constant 0 : i32
    return %c0_i32, %c0_i32_0 : i32, i32
  }
  func.func @transform_13(%arg0: i32, %arg1: i32) -> (i32, i32) {
    %c0_i32 = arith.constant 0 : i32
    %c0_i32_0 = arith.constant 0 : i32
    %c0_i32_1 = arith.constant 0 : i32
    return %c0_i32, %c0_i32_0 : i32, i32
  }
  func.func @transform_14(%arg0: i32, %arg1: i32) -> (i32, i32, i32) {
    %c0_i32 = arith.constant 0 : i32
    %c0_i32_0 = arith.constant 0 : i32
    return %arg0, %arg1, %c0_i32 : i32, i32, i32
  }
}

module attributes {stable_mosaic.version = 11 : i64} {
  func.func @kernel(%arg0: i32, %arg1: i32, %arg2: memref<1x8x128xf32, #tpu.memory_space<vmem>>, %arg3: memref<1x128x128xbf16, #tpu.memory_space<vmem>>, %arg4: memref<128x256xbf16, #tpu.memory_space<vmem>>, %arg5: memref<1x128xf32, #tpu.memory_space<vmem>>, %arg6: memref<1x128xf32, #tpu.memory_space<vmem>>, %arg7: memref<1x128x128xbf16, #tpu.memory_space<vmem>>, %arg8: memref<128x128xbf16, #tpu.memory_space<vmem>>, %arg9: memref<1x128xf32, #tpu.memory_space<vmem>>, %arg10: memref<1x128x128xbf16, #tpu.memory_space<vmem>>, %arg11: memref<128x128xbf16, #tpu.memory_space<vmem>>, %arg12: memref<1x128xf32, #tpu.memory_space<vmem>>, %arg13: memref<1x128x128xbf16, #tpu.memory_space<vmem>>, %arg14: memref<128x128xbf16, #tpu.memory_space<vmem>>, %arg15: memref<1x128xf32, #tpu.memory_space<vmem>>, %arg16: memref<1x8x128xf32, #tpu.memory_space<vmem>>, %arg17: memref<16x128xbf16, #tpu.memory_space<vmem>>, %arg18: memref<16x128xbf16, #tpu.memory_space<vmem>>, %arg19: memref<16x128xbf16, #tpu.memory_space<vmem>>, %arg20: memref<16x128xbf16, #tpu.memory_space<vmem>>) attributes {dimension_semantics = [#tpu.dimension_semantics<parallel>, #tpu.dimension_semantics<arbitrary>], iteration_bounds = array<i64: 2, 2>, scalar_prefetch = 0 : i64, scratch_operands = 4 : i64, tpu.core_type = #tpu.core_type<tc>, window_params = [{transform_indices = @transform_0, window_bounds = array<i64: 1, 8, 128>}, {pipeline_mode = #tpu.pipeline_mode<synchronous>, transform_indices = @transform_1, window_bounds = array<i64: 1, 128, 128>}, {pipeline_mode = #tpu.pipeline_mode<synchronous>, transform_indices = @transform_2, window_bounds = array<i64: 128, 256>}, {pipeline_mode = #tpu.pipeline_mode<synchronous>, transform_indices = @transform_3, window_bounds = array<i64: 1, 128>}, {pipeline_mode = #tpu.pipeline_mode<synchronous>, transform_indices = @transform_4, window_bounds = array<i64: 1, 128>}, {pipeline_mode = #tpu.pipeline_mode<synchronous>, transform_indices = @transform_5, window_bounds = array<i64: 1, 128, 128>}, {pipeline_mode = #tpu.pipeline_mode<synchronous>, transform_indices = @transform_6, window_bounds = array<i64: 128, 128>}, {pipeline_mode = #tpu.pipeline_mode<synchronous>, transform_indices = @transform_7, window_bounds = array<i64: 1, 128>}, {pipeline_mode = #tpu.pipeline_mode<synchronous>, transform_indices = @transform_8, window_bounds = array<i64: 1, 128, 128>}, {pipeline_mode = #tpu.pipeline_mode<synchronous>, transform_indices = @transform_9, window_bounds = array<i64: 128, 128>}, {pipeline_mode = #tpu.pipeline_mode<synchronous>, transform_indices = @transform_10, window_bounds = array<i64: 1, 128>}, {pipeline_mode = #tpu.pipeline_mode<synchronous>, transform_indices = @transform_11, window_bounds = array<i64: 1, 128, 128>}, {pipeline_mode = #tpu.pipeline_mode<synchronous>, transform_indices = @transform_12, window_bounds = array<i64: 128, 128>}, {pipeline_mode = #tpu.pipeline_mode<synchronous>, transform_indices = @transform_13, window_bounds = array<i64: 1, 128>}, {transform_indices = @transform_14, window_bounds = array<i64: 1, 8, 128>}]} {
    %c0 = arith.constant 0 : index
    %c0_0 = arith.constant 0 : index
    %c0_1 = arith.constant 0 : index
    %0 = vector.load %arg2[%c0, %c0_0, %c0_1] : memref<1x8x128xf32, #tpu.memory_space<vmem>>, vector<1x8x128xf32>
    %1 = vector.shape_cast %0 : vector<1x8x128xf32> to vector<8x128xf32>
    %c0_i32 = arith.constant 0 : i32
    %2 = arith.cmpi eq, %arg1, %c0_i32 : i32
    %3 = arith.extui %2 : i1 to i32
    %c0_i32_2 = arith.constant 0 : i32
    %4 = arith.cmpi ne, %3, %c0_i32_2 : i32
    scf.if %4 {
      %cst_68 = arith.constant 0.000000e+00 : bf16
      %84 = vector.broadcast %cst_68 : bf16 to vector<1x128xbf16>
      %c7_69 = arith.constant 7 : index
      %c0_70 = arith.constant 0 : index
      %85 = vector.load %arg17[%c7_69, %c0_70] : memref<16x128xbf16, #tpu.memory_space<vmem>>, vector<1x128xbf16>
      tpu.vector_store %arg17[%c7_69, %c0_70], %84 {strides = array<i32>} : memref<16x128xbf16, #tpu.memory_space<vmem>>, vector<1x128xbf16>,
      %cst_71 = arith.constant 0.000000e+00 : bf16
      %86 = vector.broadcast %cst_71 : bf16 to vector<1x128xbf16>
      %c7_72 = arith.constant 7 : index
      %c0_73 = arith.constant 0 : index
      %87 = vector.load %arg18[%c7_72, %c0_73] : memref<16x128xbf16, #tpu.memory_space<vmem>>, vector<1x128xbf16>
      tpu.vector_store %arg18[%c7_72, %c0_73], %86 {strides = array<i32>} : memref<16x128xbf16, #tpu.memory_space<vmem>>, vector<1x128xbf16>,
    } else {
    }
    %c0_i32_3 = arith.constant 0 : i32
    %5 = arith.cmpi sgt, %arg1, %c0_i32_3 : i32
    %6 = arith.extui %5 : i1 to i32
    %c0_i32_4 = arith.constant 0 : i32
    %7 = arith.cmpi ne, %6, %c0_i32_4 : i32
    scf.if %7 {
      %c15 = arith.constant 15 : index
      %c0_68 = arith.constant 0 : index
      %84 = vector.load %arg17[%c15, %c0_68] : memref<16x128xbf16, #tpu.memory_space<vmem>>, vector<1x128xbf16>
      %c15_69 = arith.constant 15 : index
      %c0_70 = arith.constant 0 : index
      %85 = vector.load %arg18[%c15_69, %c0_70] : memref<16x128xbf16, #tpu.memory_space<vmem>>, vector<1x128xbf16>
      %c7_71 = arith.constant 7 : index
      %c0_72 = arith.constant 0 : index
      %86 = vector.load %arg17[%c7_71, %c0_72] : memref<16x128xbf16, #tpu.memory_space<vmem>>, vector<1x128xbf16>
      tpu.vector_store %arg17[%c7_71, %c0_72], %84 {strides = array<i32>} : memref<16x128xbf16, #tpu.memory_space<vmem>>, vector<1x128xbf16>,
      %c7_73 = arith.constant 7 : index
      %c0_74 = arith.constant 0 : index
      %87 = vector.load %arg18[%c7_73, %c0_74] : memref<16x128xbf16, #tpu.memory_space<vmem>>, vector<1x128xbf16>
      tpu.vector_store %arg18[%c7_73, %c0_74], %85 {strides = array<i32>} : memref<16x128xbf16, #tpu.memory_space<vmem>>, vector<1x128xbf16>,
    } else {
    }
    %8 = arith.truncf %1 : vector<8x128xf32> to vector<8x128xbf16>
    %c8 = arith.constant 8 : index
    %c0_5 = arith.constant 0 : index
    %9 = vector.load %arg17[%c8, %c0_5] : memref<16x128xbf16, #tpu.memory_space<vmem>>, vector<8x128xbf16>
    tpu.vector_store %arg17[%c8, %c0_5], %8 {strides = array<i32>} : memref<16x128xbf16, #tpu.memory_space<vmem>>, vector<8x128xbf16>,
    %c0_6 = arith.constant 0 : index
    %c0_7 = arith.constant 0 : index
    %10 = vector.load %arg4[%c0_6, %c0_7] : memref<128x256xbf16, #tpu.memory_space<vmem>>, vector<128x256xbf16>
    %cst = arith.constant dense<0.000000e+00> : vector<8x256xf32>
    %11 = tpu.matmul %8, %10, %cst {dimension_numbers = #tpu.dot_dimension_numbers<[1], [0], [0], [1], [0, 0, 1, 1], [], []>} : vector<8x128xbf16>, vector<128x256xbf16>, vector<8x256xf32> -> vector<8x256xf32>
    %12 = vector.extract_strided_slice %11 {offsets = [0, 128], sizes = [8, 128], strides = [1, 1]} : vector<8x256xf32> to vector<8x128xf32>
    %c0_8 = arith.constant 0 : index
    %c0_9 = arith.constant 0 : index
    %13 = vector.load %arg6[%c0_8, %c0_9] : memref<1x128xf32, #tpu.memory_space<vmem>>, vector<1x128xf32>
    %14 = vector.broadcast %13 : vector<1x128xf32> to vector<8x128xf32>
    %15 = arith.addf %12, %14 : vector<8x128xf32>
    %16 = vector.extract_strided_slice %11 {offsets = [0, 0], sizes = [8, 128], strides = [1, 1]} : vector<8x256xf32> to vector<8x128xf32>
    %c7 = arith.constant 7 : index
    %c0_10 = arith.constant 0 : index
    %17 = vector.load %arg17[%c7, %c0_10] : memref<16x128xbf16, #tpu.memory_space<vmem>>, vector<8x128xbf16>
    %c0_11 = arith.constant 0 : index
    %c0_12 = arith.constant 0 : index
    %c0_13 = arith.constant 0 : index
    %18 = vector.load %arg3[%c0_11, %c0_12, %c0_13] : memref<1x128x128xbf16, #tpu.memory_space<vmem>>, vector<1x128x128xbf16>
    %19 = vector.shape_cast %18 : vector<1x128x128xbf16> to vector<128x128xbf16>
    %cst_14 = arith.constant dense<0.000000e+00> : vector<8x128xf32>
    %20 = tpu.matmul %17, %19, %cst_14 {dimension_numbers = #tpu.dot_dimension_numbers<[1], [0], [0], [1], [0, 0, 1, 1], [], []>} : vector<8x128xbf16>, vector<128x128xbf16>, vector<8x128xf32> -> vector<8x128xf32>
    %21 = arith.addf %16, %20 : vector<8x128xf32>
    %c0_15 = arith.constant 0 : index
    %c0_16 = arith.constant 0 : index
    %22 = vector.load %arg5[%c0_15, %c0_16] : memref<1x128xf32, #tpu.memory_space<vmem>>, vector<1x128xf32>
    %23 = vector.broadcast %22 : vector<1x128xf32> to vector<8x128xf32>
    %24 = arith.addf %21, %23 : vector<8x128xf32>
    %cst_17 = arith.constant 0.000000e+00 : f32
    %25 = vector.broadcast %cst_17 : f32 to vector<8x128xf32>
    %26 = arith.maximumf %24, %25 : vector<8x128xf32>
    %27 = arith.truncf %26 : vector<8x128xf32> to vector<8x128xbf16>
    %c8_18 = arith.constant 8 : index
    %c0_19 = arith.constant 0 : index
    %28 = vector.load %arg18[%c8_18, %c0_19] : memref<16x128xbf16, #tpu.memory_space<vmem>>, vector<8x128xbf16>
    tpu.vector_store %arg18[%c8_18, %c0_19], %27 {strides = array<i32>} : memref<16x128xbf16, #tpu.memory_space<vmem>>, vector<8x128xbf16>,
    %c0_20 = arith.constant 0 : index
    %c0_21 = arith.constant 0 : index
    %29 = vector.load %arg8[%c0_20, %c0_21] : memref<128x128xbf16, #tpu.memory_space<vmem>>, vector<128x128xbf16>
    %cst_22 = arith.constant dense<0.000000e+00> : vector<8x128xf32>
    %30 = tpu.matmul %27, %29, %cst_22 {dimension_numbers = #tpu.dot_dimension_numbers<[1], [0], [0], [1], [0, 0, 1, 1], [], []>} : vector<8x128xbf16>, vector<128x128xbf16>, vector<8x128xf32> -> vector<8x128xf32>
    %c7_23 = arith.constant 7 : index
    %c0_24 = arith.constant 0 : index
    %31 = vector.load %arg18[%c7_23, %c0_24] : memref<16x128xbf16, #tpu.memory_space<vmem>>, vector<8x128xbf16>
    %c0_25 = arith.constant 0 : index
    %c0_26 = arith.constant 0 : index
    %c0_27 = arith.constant 0 : index
    %32 = vector.load %arg7[%c0_25, %c0_26, %c0_27] : memref<1x128x128xbf16, #tpu.memory_space<vmem>>, vector<1x128x128xbf16>
    %33 = vector.shape_cast %32 : vector<1x128x128xbf16> to vector<128x128xbf16>
    %cst_28 = arith.constant dense<0.000000e+00> : vector<8x128xf32>
    %34 = tpu.matmul %31, %33, %cst_28 {dimension_numbers = #tpu.dot_dimension_numbers<[1], [0], [0], [1], [0, 0, 1, 1], [], []>} : vector<8x128xbf16>, vector<128x128xbf16>, vector<8x128xf32> -> vector<8x128xf32>
    %35 = arith.addf %30, %34 : vector<8x128xf32>
    %c0_29 = arith.constant 0 : index
    %c0_30 = arith.constant 0 : index
    %36 = vector.load %arg9[%c0_29, %c0_30] : memref<1x128xf32, #tpu.memory_space<vmem>>, vector<1x128xf32>
    %37 = vector.broadcast %36 : vector<1x128xf32> to vector<8x128xf32>
    %38 = arith.addf %35, %37 : vector<8x128xf32>
    %cst_31 = arith.constant 0.000000e+00 : f32
    %39 = vector.broadcast %cst_31 : f32 to vector<8x128xf32>
    %40 = arith.maximumf %38, %39 : vector<8x128xf32>
    %41 = arith.addf %40, %15 : vector<8x128xf32>
    %cst_32 = arith.constant 0.000000e+00 : f32
    %42 = vector.broadcast %cst_32 : f32 to vector<8x128xf32>
    %43 = arith.maximumf %41, %42 : vector<8x128xf32>
    %c0_i32_33 = arith.constant 0 : i32
    %44 = arith.cmpi eq, %arg1, %c0_i32_33 : i32
    %45 = arith.extui %44 : i1 to i32
    %c0_i32_34 = arith.constant 0 : i32
    %46 = arith.cmpi ne, %45, %c0_i32_34 : i32
    scf.if %46 {
      %cst_68 = arith.constant 0.000000e+00 : bf16
      %84 = vector.broadcast %cst_68 : bf16 to vector<2x128xbf16>
      %c6_69 = arith.constant 6 : index
      %c0_70 = arith.constant 0 : index
      %85 = vector.load %arg19[%c6_69, %c0_70] : memref<16x128xbf16, #tpu.memory_space<vmem>>, vector<2x128xbf16>
      tpu.vector_store %arg19[%c6_69, %c0_70], %84 {strides = array<i32>} : memref<16x128xbf16, #tpu.memory_space<vmem>>, vector<2x128xbf16>,
      %cst_71 = arith.constant 0.000000e+00 : bf16
      %86 = vector.broadcast %cst_71 : bf16 to vector<2x128xbf16>
      %c6_72 = arith.constant 6 : index
      %c0_73 = arith.constant 0 : index
      %87 = vector.load %arg20[%c6_72, %c0_73] : memref<16x128xbf16, #tpu.memory_space<vmem>>, vector<2x128xbf16>
      tpu.vector_store %arg20[%c6_72, %c0_73], %86 {strides = array<i32>} : memref<16x128xbf16, #tpu.memory_space<vmem>>, vector<2x128xbf16>,
    } else {
    }
    %c0_i32_35 = arith.constant 0 : i32
    %47 = arith.cmpi sgt, %arg1, %c0_i32_35 : i32
    %48 = arith.extui %47 : i1 to i32
    %c0_i32_36 = arith.constant 0 : i32
    %49 = arith.cmpi ne, %48, %c0_i32_36 : i32
    scf.if %49 {
      %c14 = arith.constant 14 : index
      %c0_68 = arith.constant 0 : index
      %84 = vector.load %arg19[%c14, %c0_68] : memref<16x128xbf16, #tpu.memory_space<vmem>>, vector<2x128xbf16>
      %c14_69 = arith.constant 14 : index
      %c0_70 = arith.constant 0 : index
      %85 = vector.load %arg20[%c14_69, %c0_70] : memref<16x128xbf16, #tpu.memory_space<vmem>>, vector<2x128xbf16>
      %c6_71 = arith.constant 6 : index
      %c0_72 = arith.constant 0 : index
      %86 = vector.load %arg19[%c6_71, %c0_72] : memref<16x128xbf16, #tpu.memory_space<vmem>>, vector<2x128xbf16>
      tpu.vector_store %arg19[%c6_71, %c0_72], %84 {strides = array<i32>} : memref<16x128xbf16, #tpu.memory_space<vmem>>, vector<2x128xbf16>,
      %c6_73 = arith.constant 6 : index
      %c0_74 = arith.constant 0 : index
      %87 = vector.load %arg20[%c6_73, %c0_74] : memref<16x128xbf16, #tpu.memory_space<vmem>>, vector<2x128xbf16>
      tpu.vector_store %arg20[%c6_73, %c0_74], %85 {strides = array<i32>} : memref<16x128xbf16, #tpu.memory_space<vmem>>, vector<2x128xbf16>,
    } else {
    }
    %50 = arith.truncf %43 : vector<8x128xf32> to vector<8x128xbf16>
    %c8_37 = arith.constant 8 : index
    %c0_38 = arith.constant 0 : index
    %51 = vector.load %arg19[%c8_37, %c0_38] : memref<16x128xbf16, #tpu.memory_space<vmem>>, vector<8x128xbf16>
    tpu.vector_store %arg19[%c8_37, %c0_38], %50 {strides = array<i32>} : memref<16x128xbf16, #tpu.memory_space<vmem>>, vector<8x128xbf16>,
    %c0_39 = arith.constant 0 : index
    %c0_40 = arith.constant 0 : index
    %52 = vector.load %arg11[%c0_39, %c0_40] : memref<128x128xbf16, #tpu.memory_space<vmem>>, vector<128x128xbf16>
    %cst_41 = arith.constant dense<0.000000e+00> : vector<8x128xf32>
    %53 = tpu.matmul %50, %52, %cst_41 {dimension_numbers = #tpu.dot_dimension_numbers<[1], [0], [0], [1], [0, 0, 1, 1], [], []>} : vector<8x128xbf16>, vector<128x128xbf16>, vector<8x128xf32> -> vector<8x128xf32>
    %c6 = arith.constant 6 : index
    %c0_42 = arith.constant 0 : index
    %54 = vector.load %arg19[%c6, %c0_42] : memref<16x128xbf16, #tpu.memory_space<vmem>>, vector<8x128xbf16>
    %c0_43 = arith.constant 0 : index
    %c0_44 = arith.constant 0 : index
    %c0_45 = arith.constant 0 : index
    %55 = vector.load %arg10[%c0_43, %c0_44, %c0_45] : memref<1x128x128xbf16, #tpu.memory_space<vmem>>, vector<1x128x128xbf16>
    %56 = vector.shape_cast %55 : vector<1x128x128xbf16> to vector<128x128xbf16>
    %cst_46 = arith.constant dense<0.000000e+00> : vector<8x128xf32>
    %57 = tpu.matmul %54, %56, %cst_46 {dimension_numbers = #tpu.dot_dimension_numbers<[1], [0], [0], [1], [0, 0, 1, 1], [], []>} : vector<8x128xbf16>, vector<128x128xbf16>, vector<8x128xf32> -> vector<8x128xf32>
    %58 = arith.addf %53, %57 : vector<8x128xf32>
    %c0_47 = arith.constant 0 : index
    %c0_48 = arith.constant 0 : index
    %59 = vector.load %arg12[%c0_47, %c0_48] : memref<1x128xf32, #tpu.memory_space<vmem>>, vector<1x128xf32>
    %60 = vector.broadcast %59 : vector<1x128xf32> to vector<8x128xf32>
    %61 = arith.addf %58, %60 : vector<8x128xf32>
    %cst_49 = arith.constant 0.000000e+00 : f32
    %62 = vector.broadcast %cst_49 : f32 to vector<8x128xf32>
    %63 = arith.maximumf %61, %62 : vector<8x128xf32>
    %64 = arith.truncf %63 : vector<8x128xf32> to vector<8x128xbf16>
    %c8_50 = arith.constant 8 : index
    %c0_51 = arith.constant 0 : index
    %65 = vector.load %arg20[%c8_50, %c0_51] : memref<16x128xbf16, #tpu.memory_space<vmem>>, vector<8x128xbf16>
    tpu.vector_store %arg20[%c8_50, %c0_51], %64 {strides = array<i32>} : memref<16x128xbf16, #tpu.memory_space<vmem>>, vector<8x128xbf16>,
    %c0_52 = arith.constant 0 : index
    %c0_53 = arith.constant 0 : index
    %66 = vector.load %arg14[%c0_52, %c0_53] : memref<128x128xbf16, #tpu.memory_space<vmem>>, vector<128x128xbf16>
    %cst_54 = arith.constant dense<0.000000e+00> : vector<8x128xf32>
    %67 = tpu.matmul %64, %66, %cst_54 {dimension_numbers = #tpu.dot_dimension_numbers<[1], [0], [0], [1], [0, 0, 1, 1], [], []>} : vector<8x128xbf16>, vector<128x128xbf16>, vector<8x128xf32> -> vector<8x128xf32>
    %c6_55 = arith.constant 6 : index
    %c0_56 = arith.constant 0 : index
    %68 = vector.load %arg20[%c6_55, %c0_56] : memref<16x128xbf16, #tpu.memory_space<vmem>>, vector<8x128xbf16>
    %c0_57 = arith.constant 0 : index
    %c0_58 = arith.constant 0 : index
    %c0_59 = arith.constant 0 : index
    %69 = vector.load %arg13[%c0_57, %c0_58, %c0_59] : memref<1x128x128xbf16, #tpu.memory_space<vmem>>, vector<1x128x128xbf16>
    %70 = vector.shape_cast %69 : vector<1x128x128xbf16> to vector<128x128xbf16>
    %cst_60 = arith.constant dense<0.000000e+00> : vector<8x128xf32>
    %71 = tpu.matmul %68, %70, %cst_60 {dimension_numbers = #tpu.dot_dimension_numbers<[1], [0], [0], [1], [0, 0, 1, 1], [], []>} : vector<8x128xbf16>, vector<128x128xbf16>, vector<8x128xf32> -> vector<8x128xf32>
    %72 = arith.addf %67, %71 : vector<8x128xf32>
    %c0_61 = arith.constant 0 : index
    %c0_62 = arith.constant 0 : index
    %73 = vector.load %arg15[%c0_61, %c0_62] : memref<1x128xf32, #tpu.memory_space<vmem>>, vector<1x128xf32>
    %74 = vector.broadcast %73 : vector<1x128xf32> to vector<8x128xf32>
    %75 = arith.addf %72, %74 : vector<8x128xf32>
    %cst_63 = arith.constant 0.000000e+00 : f32
    %76 = vector.broadcast %cst_63 : f32 to vector<8x128xf32>
    %77 = arith.maximumf %75, %76 : vector<8x128xf32>
    %78 = arith.addf %77, %43 : vector<8x128xf32>
    %cst_64 = arith.constant 0.000000e+00 : f32
    %79 = vector.broadcast %cst_64 : f32 to vector<8x128xf32>
    %80 = arith.maximumf %78, %79 : vector<8x128xf32>
    %c0_65 = arith.constant 0 : index
    %c0_66 = arith.constant 0 : index
    %c0_67 = arith.constant 0 : index
    %81 = vector.load %arg16[%c0_65, %c0_66, %c0_67] : memref<1x8x128xf32, #tpu.memory_space<vmem>>, vector<1x8x128xf32>
    %82 = vector.shape_cast %81 : vector<1x8x128xf32> to vector<8x128xf32>
    %83 = vector.shape_cast %80 : vector<8x128xf32> to vector<1x8x128xf32>
    tpu.vector_store %arg16[%c0_65, %c0_66, %c0_67], %83 {strides = array<i32>} : memref<1x8x128xf32, #tpu.memory_space<vmem>>, vector<1x8x128xf32>,
    return
  }
  func.func @transform_0(%arg0: i32, %arg1: i32) -> (i32, i32, i32) {
    %c0_i32 = arith.constant 0 : i32
    %c0_i32_0 = arith.constant 0 : i32
    return %arg0, %arg1, %c0_i32 : i32, i32, i32
  }
  func.func @transform_1(%arg0: i32, %arg1: i32) -> (i32, i32, i32) {
    %c0_i32 = arith.constant 0 : i32
    %c0_i32_0 = arith.constant 0 : i32
    %c0_i32_1 = arith.constant 0 : i32
    %c0_i32_2 = arith.constant 0 : i32
    return %c0_i32, %c0_i32_0, %c0_i32_1 : i32, i32, i32
  }
  func.func @transform_2(%arg0: i32, %arg1: i32) -> (i32, i32) {
    %c0_i32 = arith.constant 0 : i32
    %c0_i32_0 = arith.constant 0 : i32
    %c0_i32_1 = arith.constant 0 : i32
    return %c0_i32, %c0_i32_0 : i32, i32
  }
  func.func @transform_3(%arg0: i32, %arg1: i32) -> (i32, i32) {
    %c0_i32 = arith.constant 0 : i32
    %c0_i32_0 = arith.constant 0 : i32
    %c0_i32_1 = arith.constant 0 : i32
    return %c0_i32, %c0_i32_0 : i32, i32
  }
  func.func @transform_4(%arg0: i32, %arg1: i32) -> (i32, i32) {
    %c0_i32 = arith.constant 0 : i32
    %c0_i32_0 = arith.constant 0 : i32
    %c0_i32_1 = arith.constant 0 : i32
    return %c0_i32, %c0_i32_0 : i32, i32
  }
  func.func @transform_5(%arg0: i32, %arg1: i32) -> (i32, i32, i32) {
    %c0_i32 = arith.constant 0 : i32
    %c0_i32_0 = arith.constant 0 : i32
    %c0_i32_1 = arith.constant 0 : i32
    %c0_i32_2 = arith.constant 0 : i32
    return %c0_i32, %c0_i32_0, %c0_i32_1 : i32, i32, i32
  }
  func.func @transform_6(%arg0: i32, %arg1: i32) -> (i32, i32) {
    %c0_i32 = arith.constant 0 : i32
    %c0_i32_0 = arith.constant 0 : i32
    %c0_i32_1 = arith.constant 0 : i32
    return %c0_i32, %c0_i32_0 : i32, i32
  }
  func.func @transform_7(%arg0: i32, %arg1: i32) -> (i32, i32) {
    %c0_i32 = arith.constant 0 : i32
    %c0_i32_0 = arith.constant 0 : i32
    %c0_i32_1 = arith.constant 0 : i32
    return %c0_i32, %c0_i32_0 : i32, i32
  }
  func.func @transform_8(%arg0: i32, %arg1: i32) -> (i32, i32, i32) {
    %c0_i32 = arith.constant 0 : i32
    %c0_i32_0 = arith.constant 0 : i32
    %c0_i32_1 = arith.constant 0 : i32
    %c0_i32_2 = arith.constant 0 : i32
    return %c0_i32, %c0_i32_0, %c0_i32_1 : i32, i32, i32
  }
  func.func @transform_9(%arg0: i32, %arg1: i32) -> (i32, i32) {
    %c0_i32 = arith.constant 0 : i32
    %c0_i32_0 = arith.constant 0 : i32
    %c0_i32_1 = arith.constant 0 : i32
    return %c0_i32, %c0_i32_0 : i32, i32
  }
  func.func @transform_10(%arg0: i32, %arg1: i32) -> (i32, i32) {
    %c0_i32 = arith.constant 0 : i32
    %c0_i32_0 = arith.constant 0 : i32
    %c0_i32_1 = arith.constant 0 : i32
    return %c0_i32, %c0_i32_0 : i32, i32
  }
  func.func @transform_11(%arg0: i32, %arg1: i32) -> (i32, i32, i32) {
    %c0_i32 = arith.constant 0 : i32
    %c0_i32_0 = arith.constant 0 : i32
    %c0_i32_1 = arith.constant 0 : i32
    %c0_i32_2 = arith.constant 0 : i32
    return %c0_i32, %c0_i32_0, %c0_i32_1 : i32, i32, i32
  }
  func.func @transform_12(%arg0: i32, %arg1: i32) -> (i32, i32) {
    %c0_i32 = arith.constant 0 : i32
    %c0_i32_0 = arith.constant 0 : i32
    %c0_i32_1 = arith.constant 0 : i32
    return %c0_i32, %c0_i32_0 : i32, i32
  }
  func.func @transform_13(%arg0: i32, %arg1: i32) -> (i32, i32) {
    %c0_i32 = arith.constant 0 : i32
    %c0_i32_0 = arith.constant 0 : i32
    %c0_i32_1 = arith.constant 0 : i32
    return %c0_i32, %c0_i32_0 : i32, i32
  }
  func.func @transform_14(%arg0: i32, %arg1: i32) -> (i32, i32, i32) {
    %c0_i32 = arith.constant 0 : i32
    %c0_i32_0 = arith.constant 0 : i32
    return %arg0, %arg1, %c0_i32 : i32, i32, i32
  }
}

</mosaic_0001>

<bundles_post_ra>
// kernel: tpu_custom_call.1
= control target key start
LH: loop header
LB: loop body
LE: loop exit
PB: predicated region body
PF: predicated region fallthrough
CT: control target
= control target key end

     0   :  { %s3205_s0 = inlined_call_operand.hbm [shape: f32[2,16,128], index: 0, kind: input, shape index: {}]   ;;  %s3206_s1 = inlined_call_operand.hbm [shape: bf16[1,128,128], index: 1, kind: input, shape index: {}]   ;;  %s3207_s2 = inlined_call_operand.hbm [shape: bf16[128,256], index: 2, kind: input, shape index: {}]   ;;  %s3208_s3 = inlined_call_operand.vmem [shape: f32[1,128], index: 3, kind: input, shape index: {}]   ;;  %s3209_s4 = inlined_call_operand.vmem [shape: f32[1,128], index: 4, kind: input, shape index: {}]   ;;  %s3210_s5 = inlined_call_operand.hbm [shape: bf16[1,128,128], index: 5, kind: input, shape index: {}]   ;;  %s3211_s6 = inlined_call_operand.hbm [shape: bf16[128,128], index: 6, kind: input, shape index: {}]   ;;  %s3212_s7 = inlined_call_operand.vmem [shape: f32[1,128], index: 7, kind: input, shape index: {}]   ;;  %s3213_s8 = inlined_call_operand.hbm [shape: bf16[1,128,128], index: 8, kind: input, shape index: {}]   ;;  %s3214_s9 = inlined_call_operand.hbm [shape: bf16[128,128], index: 9, kind: input, shape index: {}]   ;;  %s3215_s10 = inlined_call_operand.vmem [shape: f32[1,128], index: 10, kind: input, shape index: {}]   ;;  %s3216_s11 = inlined_call_operand.hbm [shape: bf16[1,128,128], index: 11, kind: input, shape index: {}]   ;;  %s3217_s12 = inlined_call_operand.hbm [shape: bf16[128,128], index: 12, kind: input, shape index: {}]   ;;  %s3218_s13 = inlined_call_operand.vmem [shape: f32[1,128], index: 13, kind: input, shape index: {}]   ;;  %s3219_s14 = inlined_call_operand.hbm [shape: f32[2,16,128], index: 14, kind: output, shape index: {}]  }
   0x1   :  { %3227 = sst [smem:[#allocation29_spill]] %s3206_s1 }
   0x2   :  { %3228 = sst [smem:[#allocation30_spill]] %s3207_s2 }
   0x3   :  { %3229 = sst [smem:[#allocation31_spill]] %s3209_s4 }
   0x4   :  { %3230 = sst [smem:[#allocation32_spill]] %s3210_s5 }
   0x5   :  { %3231 = sst [smem:[#allocation33_spill]] %s3211_s6 }
   0x6   :  { %3232 = sst [smem:[#allocation34_spill]] %s3212_s7 }
   0x7   :  { %3233 = sst [smem:[#allocation35_spill]] %s3213_s8 }
   0x8   :  { %3234 = sst [smem:[#allocation36_spill]] %s3214_s9 }
   0x9   :  { %3235 = sst [smem:[#allocation37_spill]] %s3215_s10 }
   0xa   :  { %3236 = sst [smem:[#allocation38_spill]] %s3216_s11 }
   0xb   :  { %3237 = sst [smem:[#allocation39_spill]] %s3217_s12 }
   0xc   :  { %3238 = sst [smem:[#allocation40_spill]] %s3218_s13 }
   0xd   :  { %3239 = sst [smem:[#allocation41_spill]] %s3219_s14 }
   0xe   :  { %19 = vsyncpa [#allocation7], 0 }
   0xf   :  { %21 = vsyncpa [#allocation7 + $0x1], 0 }
  0x10   :  { %22 = vsyncpa [#allocation10], 0 }
  0x11   :  { %23 = vsyncpa [#allocation13], 0 }
  0x12   :  { %24 = vsyncpa [#allocation16], 0 }
  0x13   :  { %25 = vsyncpa [#allocation19], 0 }
  0x14   :  { %26 = vsyncpa [#allocation8], 0 }
  0x15   :  { %28 = vsyncpa [#allocation8 + $0x1], 0  ;;  %s2822_s29 = smov 0   ;;  %s2824_s30 = smov 0  }
  0x16   :  { %s2826_s15 = smov 0   ;;  %s2828_s16 = smov 0  }
  0x17   :  { %s2830_s17 = smov 0   ;;  %s2832_s18 = smov 0  }
  0x18   :  { %s2834_s19 = smov 0   ;;  %s2836_s20 = smov 0  }
  0x19 LB: > { %3240 = sst [smem:[#allocation28_spill]] %s2715_s17  ;;  %s3220_s21 = sadd.s32 4294967295, %s2727_s20   ;;  %s2727_s20 = sphi %s2836_s20, %s34_s20   ;;  %s2723_s19 = sphi %s2834_s19, %s3275_s19   ;;  %s2719_s18 = sphi %s2832_s18, %s3274_s18   ;;  %s2715_s17 = sphi %s2830_s17, %s3273_s17   ;;  %s2711_s16 = sphi %s2828_s16, %s3272_s16   ;;  %s2707_s15 = sphi %s2826_s15, %s3271_s15   ;;  %s2703_s30 = sphi %s2824_s30, %s3270_s30   ;;  %s2699_s29 = sphi %s2822_s29, %s3269_s29  }
  0x1a   : > { %p1811_p0 = scmp.ge.s32.totalorder %s2727_s20, 1  ;;  %p2866_p1 = scmp.eq.s32.totalorder %s3220_s21, 0 }
  0x1b   : > { %p380_p2 = scmp.lt.s32.totalorder %s2727_s20, 5  ;;  %s2729_s24 = smov [#allocation9]  }
  0x1c   : > { %s392_s25 = sshll.u32 %s2729_s24, 4  ;;  %s2730_s27 = smov [#allocation12]   ;;  %s393_s25 = int_to_ptr.vmem [resolvable:$true] %s392_s25 }
  0x1d   : > { %p2871_p3 = pnand %p1811_p0, %p380_p2  ;;  %s424_s28 = sshll.u32 %s2730_s27, 4  ;;  %s425_s28 = int_to_ptr.vmem [resolvable:$true] %s424_s28 }
  0x1e   : > { %s2731_s21 = smov [#allocation15]   ;;  %s2390_s24 = scalar_lea.vmem %s393_s25, 1024 }
  0x1f   : > { %p2164_p4 = pneg %p2871_p3  ;;  %s453_s14 = sshll.u32 %s2731_s21, 4  ;;  %s454_s14 = int_to_ptr.vmem [resolvable:$true] %s453_s14 }
  0x20   : > { %p2391_p7 = scmp.ne.s32.totalorder %s393_s25, %s2390_s24  ;;  %p2398_p10 = scmp.lt.s32.totalorder %s393_s25, %s393_s25 }
  0x21   : > { %p2879_p5 = pnand %p2164_p4, %p2866_p1  ;;  %p2399_p11 = scmp.lt.s32.totalorder %s2390_s24, %s2390_s24 }
  0x23   : > { %p2885_p6 = pneg %p2879_p5  ;;  %p2400_p12 = por %p2399_p11, %p2398_p10 }
  0x25   : > { %p2393_p8 = pnand %p2391_p7, %p2885_p6 }
  0x27   : > { %p2394_p9 = pneg %p2393_p8 }
  0x29   : > { %p2401_p13 = pnand %p2400_p12, %p2394_p9 }
  0x2b   : > { %2404 = shalt.err (!%p2401_p13)
}
  0x2c   : > { %s3222_s27 = smov 64   ;;  %s3224_s21 = smov 4  }
  0x2d   : > { %s3245_s1 = sld [smem:[#allocation29_spill]]  ;;  %s2416_s4 = scalar_lea.vmem %s425_s28, 1024 }
  0x2e   : > { %p2417_p0 = scmp.ne.s32.totalorder %s425_s28, %s2416_s4  ;;  %p2424_p7 = scmp.lt.s32.totalorder %s425_s28, %s425_s28 }
  0x2f   : > { %p2425_p8 = scmp.lt.s32.totalorder %s2416_s4, %s2416_s4 }
  0x30   : > { %p2419_p2 = pnand %p2417_p0, %p2885_p6 }
  0x31   : > { %p2426_p9 = por %p2425_p8, %p2424_p7 }
  0x32   : > { %p2420_p4 = pneg %p2419_p2 }
  0x33   : > { %2167 = dma.hbm_to_vmem [thread:$0]  (!%p2879_p5), %s3245_s1, 1024, %s393_s25, [#allocation10], %s3222_s27, %s3222_s27, %s3224_s21  }
  0x34   : > { %p2427_p10 = pnand %p2426_p9, %p2420_p4 }
  0x36   : > { %2430 = shalt.err (!%p2427_p10)
}
  0x37   : > { %s3246_s5 = sld [smem:[#allocation32_spill]]  ;;  %s2442_s10 = scalar_lea.vmem %s454_s14, 1024 }
  0x38   : > { %p2443_p11 = scmp.ne.s32.totalorder %s454_s14, %s2442_s10  ;;  %p2450_p0 = scmp.lt.s32.totalorder %s454_s14, %s454_s14 }
  0x39   : > { %p2451_p2 = scmp.lt.s32.totalorder %s2442_s10, %s2442_s10 }
  0x3a   : > { %p2445_p12 = pnand %p2443_p11, %p2885_p6 }
  0x3b   : > { %p2452_p4 = por %p2451_p2, %p2450_p0 }
  0x3c   : > { %p2446_p13 = pneg %p2445_p12 }
  0x3d   : > { %2173 = dma.hbm_to_vmem [thread:$0]  (!%p2879_p5), %s3246_s5, 1024, %s425_s28, [#allocation13], %s3222_s27, %s3222_s27, %s3224_s21  }
  0x3e   : > { %p2453_p7 = pnand %p2452_p4, %p2446_p13 }
  0x40   : > { %2456 = shalt.err (!%p2453_p7)
}
  0x41   : > { %s3247_s8 = sld [smem:[#allocation35_spill]]  ;;  %s2734_s17 = smov [#allocation18]  }
  0x42   : > { %s482_s25 = sshll.u32 %s2734_s17, 4  ;;  %s2735_s28 = smov [#allocation11]   ;;  %s483_s25 = int_to_ptr.vmem [resolvable:$true] %s482_s25 }
  0x43   : > { %s405_s24 = sshll.u32 %s2735_s28, 4  ;;  %s2468_s1 = scalar_lea.vmem %s483_s25, 1024  ;;  %s406_s24 = int_to_ptr.vmem [resolvable:$true] %s405_s24 }
  0x44   : > { %p2469_p8 = scmp.ne.s32.totalorder %s483_s25, %s2468_s1  ;;  %p2476_p11 = scmp.lt.s32.totalorder %s483_s25, %s483_s25 }
  0x45   : > { %p2477_p12 = scmp.lt.s32.totalorder %s2468_s1, %s2468_s1 }
  0x46   : > { %p2471_p9 = pnand %p2469_p8, %p2885_p6 }
  0x47   : > { %2179 = dma.hbm_to_vmem [thread:$0]  (!%p2879_p5), %s3247_s8, 1024, %s454_s14, [#allocation16], %s3222_s27, %s3222_s27, %s3224_s21  }
  0x48   : > { %p2472_p10 = pneg %p2471_p9  ;;  %p2478_p13 = por %p2477_p12, %p2476_p11 }
  0x4a   : > { %p2479_p0 = pnand %p2478_p13, %p2472_p10 }
  0x4c   : > { %2482 = shalt.err (!%p2479_p0)
}
  0x4d   : > { %s3248_s11 = sld [smem:[#allocation38_spill]]  ;;  %s2494_s4 = scalar_lea.vmem %s406_s24, 2048 }
  0x4e   : > { %p2495_p2 = scmp.ne.s32.totalorder %s406_s24, %s2494_s4  ;;  %p2502_p8 = scmp.lt.s32.totalorder %s406_s24, %s406_s24 }
  0x4f   : > { %p2503_p9 = scmp.lt.s32.totalorder %s2494_s4, %s2494_s4 }
  0x50   : > { %p2497_p4 = pnand %p2495_p2, %p2885_p6 }
  0x51   : > { %p2504_p10 = por %p2503_p9, %p2502_p8 }
  0x52   : > { %p2498_p7 = pneg %p2497_p4 }
  0x53   : > { %2185 = dma.hbm_to_vmem [thread:$0]  (!%p2879_p5), %s3248_s11, 1024, %s483_s25, [#allocation19], %s3222_s27, %s3222_s27, %s3224_s21  }
  0x54   : > { %p2505_p11 = pnand %p2504_p10, %p2498_p7 }
  0x56   : > { %2508 = shalt.err (!%p2505_p11)
}
  0x57   : > { %s2736_s1 = smov 128   ;;  %s2737_s7 = smov 8  }
  0x58   : > { %s3249_s2 = sld [smem:[#allocation30_spill]]  ;;  %s2738_s25 = smov [#allocation14]  }
  0x59   : > { %s437_s14 = sshll.u32 %s2738_s25, 4  ;;  %s2739_s10 = smov [#allocation17]   ;;  %s438_s14 = int_to_ptr.vmem [resolvable:$true] %s437_s14 }
  0x5a   : > { %s466_s27 = sshll.u32 %s2739_s10, 4  ;;  %s2520_s21 = scalar_lea.vmem %s438_s14, 1024  ;;  %s467_s27 = int_to_ptr.vmem [resolvable:$true] %s466_s27 }
  0x5b   : > { %p2521_p12 = scmp.ne.s32.totalorder %s438_s14, %s2520_s21  ;;  %p2528_p2 = scmp.lt.s32.totalorder %s438_s14, %s438_s14 }
  0x5c   : > { %p2529_p4 = scmp.lt.s32.totalorder %s2520_s21, %s2520_s21 }
  0x5d   : > { %p2523_p13 = pnand %p2521_p12, %p2885_p6 }
  0x5e   : > { %2170 = dma.hbm_to_vmem [thread:$0]  (!%p2879_p5), %s3249_s2, 2048, %s406_s24, [#allocation10], %s2736_s1, %s2736_s1, %s2737_s7  }
  0x5f   : > { %p2524_p0 = pneg %p2523_p13  ;;  %p2530_p7 = por %p2529_p4, %p2528_p2 }
  0x61   : > { %p2531_p8 = pnand %p2530_p7, %p2524_p0 }
  0x63   : > { %2534 = shalt.err (!%p2531_p8)
}
  0x64   : > { %s3250_s4 = smov 4   ;;  %s3251_s17 = smov 64  }
  0x65   : > { %s3252_s6 = sld [smem:[#allocation33_spill]]  ;;  %s2546_s7 = scalar_lea.vmem %s467_s27, 1024 }
  0x66   : > { %p2547_p9 = scmp.ne.s32.totalorder %s467_s27, %s2546_s7  ;;  %p2554_p12 = scmp.lt.s32.totalorder %s467_s27, %s467_s27 }
  0x67   : > { %p2555_p13 = scmp.lt.s32.totalorder %s2546_s7, %s2546_s7 }
  0x68   : > { %p2549_p10 = pnand %p2547_p9, %p2885_p6 }
  0x69   : > { %p2556_p0 = por %p2555_p13, %p2554_p12 }
  0x6a   : > { %p2550_p11 = pneg %p2549_p10 }
  0x6b   : > { %2176 = dma.hbm_to_vmem [thread:$0]  (!%p2879_p5), %s3252_s6, 1024, %s438_s14, [#allocation13], %s3251_s17, %s3251_s17, %s3250_s4  }
  0x6c   : > { %p2557_p2 = pnand %p2556_p0, %p2550_p11 }
  0x6e   : > { %2560 = shalt.err (!%p2557_p2)
}
  0x6f   : > { %s3253_s9 = sld [smem:[#allocation36_spill]]  ;;  %s2740_s25 = smov [#allocation20]  }
  0x70   : > { %s495_s14 = sshll.u32 %s2740_s25, 4  ;;  %s496_s14 = int_to_ptr.vmem [resolvable:$true] %s495_s14 }
  0x71   : > { %s2572_s10 = scalar_lea.vmem %s496_s14, 1024  ;;  %p2580_p9 = scmp.lt.s32.totalorder %s496_s14, %s496_s14 }
  0x72   : > { %p2573_p4 = scmp.ne.s32.totalorder %s496_s14, %s2572_s10  ;;  %p2581_p10 = scmp.lt.s32.totalorder %s2572_s10, %s2572_s10 }
  0x74   : > { %p2575_p7 = pnand %p2573_p4, %p2885_p6  ;;  %p2582_p11 = por %p2581_p10, %p2580_p9 }
  0x75   : > { %2182 = dma.hbm_to_vmem [thread:$0]  (!%p2879_p5), %s3253_s9, 1024, %s467_s27, [#allocation16], %s3251_s17, %s3251_s17, %s3250_s4  }
  0x76   : > { %p2576_p8 = pneg %p2575_p7 }
  0x78   : > { %p2583_p12 = pnand %p2582_p11, %p2576_p8 }
  0x7a   : > { %2586 = shalt.err (!%p2583_p12)
}
  0x7b   : > { %s3254_s12 = sld [smem:[#allocation39_spill]]  ;;  %s43_s13 = sadd.s32 1, %s2719_s18 }
  0x7c   : > { %p44_p6 = scmp.ge.s32.totalorder %s43_s13, 2  ;;  %s46_s26 = sadd.s32 1, %s2723_s19 }
  0x7d   : > { %s1810_s1 = sadd.s32 4294967294, %s2727_s20   ;;  %s55_s7 = sadd.s32 1, %s2707_s15 }
  0x7e   : > { %s3277_s13 = smov (%p44_p6, %s43_s13), 0  ;;  %s3279_s26 = smov (!%p44_p6, %s46_s26), %s2723_s19 }
  0x7f   : > { %s51_s21 = ssub.s32 %s2719_s18, %s3277_s13  ;;  %p62_p13 = scmp.ne.s32.totalorder %s2707_s15, %s2703_s30 }
  0x80   : > { %p48_p0 = scmp.ge.s32.totalorder %s3279_s26, 2  ;;  %p68_p2 = scmp.ne.s32.totalorder %s2703_s30, %s2699_s29 }
  0x81   : > { %2188 = dma.hbm_to_vmem [thread:$0]  (!%p2879_p5), %s3254_s12, 1024, %s496_s14, [#allocation19], %s3251_s17, %s3251_s17, %s3250_s4  }
  0x82   : > { %p63_p4 = scmp.eq.s32.totalorder %s2727_s20, 0  ;;  %s3255_s4 = sadd.s32 4294967295, %s2727_s20  }
  0x83   : > { %p367_p5 = scmp.eq.s32.totalorder %s3255_s4, 3  ;;  %s3281_s26 = smov (%p48_p0, %s3279_s26), 0 }
  0x84   : > { %p2986_p7 = por %p2866_p1, %p68_p2  ;;  %s50_s25 = ssub.s32 %s2723_s19, %s3281_s26 }
  0x85   : > { %p2990_p8 = por %p367_p5, %p62_p13  ;;  %p373_p9 = scmp.eq.s32.totalorder %s1810_s1, 3 }
  0x86   : > { %s52_s14 = sor.u32 %s51_s21, %s50_s25  ;;  %p2996_p10 = por %p63_p4, %p62_p13 }
  0x87   : > { %s3257_s28 = scalar_select %p2990_p8, 1, 0 }
  0x88   : > { %p53_p11 = scmp.eq.s32.totalorder %s52_s14, 0  ;;  %p3000_p12 = por %p373_p9, %p68_p2 }
  0x89   : > { %s512_s27 = sand.u32 1, %s2707_s15   ;;  %s1822_s4 = sshll.u32 %s2723_s19, 1 }
  0x8a   : > { %s3259_s24 = scalar_select %p3000_p12, 1, 0 }
  0x8b   : > { %s3007_s2 = scalar_select %p53_p11, %s2707_s15, %s55_s7  }
  0x8c   : > { %p2205_p6 = scmp.lt.s32.totalorder %s2727_s20, 4  ;;  %s1821_s5 = sshll.u32 %s512_s27, 3 }
  0x8d   : > { %s521_s6 = sadd.s32 %s2719_s18, %s1822_s4  ;;  %s516_s1 = scalar_lea.vmem [#allocation6], %s1821_s5 }
  0x8e   : > { %s1823_s8 = sshll.u32 %s521_s6, 7  ;;  %s525_s21 = sshll.u32 %s516_s1, 4  ;;  %s526_s21 = int_to_ptr.vmem [resolvable:$true] %s525_s21 }
  0x8f   : > { %s523_s11 = scalar_lea.hbm %s3205_s0, %s1823_s8  ;;  %p3016_p13 = pnand %p2205_p6, %p2996_p10 }
  0x90   : > { %s513_s12 = scalar_lea.sflag [#allocation7], %s512_s27  ;;  %s2600_s7 = scalar_lea.vmem %s526_s21, 128 }
  0x91   : > { %p2589_p0 = pneg %p3016_p13  ;;  %p2601_p2 = scmp.ne.s32.totalorder %s526_s21, %s2600_s7 }
  0x92   : > { %s2741_s5 = smov [#allocation6]  }
  0x93   : > { %p2603_p4 = pnand %p2601_p2, %p2589_p0  ;;  %s2605_s6 = sshll.u32 %s2741_s5, 4  ;;  %s2606_s6 = int_to_ptr.vmem [resolvable:$false] %s2605_s6 }
  0x94   : > { %s2607_s4 = scalar_lea.vmem %s2606_s6, 256  ;;  %p2608_p9 = scmp.lt.s32.totalorder %s526_s21, %s2606_s6 }
  0x95   : > { %p2604_p5 = pneg %p2603_p4  ;;  %p2609_p11 = scmp.lt.s32.totalorder %s2607_s4, %s2600_s7 }
  0x97   : > { %p2610_p12 = por %p2609_p11, %p2608_p9 }
  0x99   : > { %p2611_p8 = pnand %p2610_p12, %p2604_p5 }
  0x9b   : > { %2614 = shalt.err (!%p2611_p8)
}
  0x9c   : > { %2192 = dma.hbm_to_vmem [thread:$0]  (!%p3016_p13), %s523_s11, 128, %s526_s21, %s513_s12  }
  0x9d   : > { %534 = sbr.rel (%p2871_p3) target bundleno = 1114 (0x45a), region = 76  ;;  %s3027_s8 = sand.u32 (!%p2871_p3), 1, %s2703_s30  }
  0x9e   : > { %s1825_s9 = sshll.u32 (!%p2871_p3), %s3027_s8, 3  ;;  %s537_s10 = scalar_lea.sflag (!%p2871_p3), [#allocation7], %s3027_s8 }
  0x9f   : > { %s540_s27 = scalar_lea.vmem (!%p2871_p3), [#allocation6], %s1825_s9 }
  0xa2   : > { %2674 = dma.done.wait (%p2986_p7), %s537_s10, 128  }
  0xa3   : > { %2676 = vsyncadd (%p2986_p7), %s537_s10, 4294967168 }
  0xa4   : > { %2678 = dma.done.wait (%p2866_p1), [#allocation10], 3072  }
  0xa5   : > { %2680 = vsyncadd (%p2866_p1), [#allocation10], 4294964224 }
  0xa6   : > { %2682 = dma.done.wait (%p2866_p1), [#allocation13], 2048  }
  0xa7   : > { %2684 = vsyncadd (%p2866_p1), [#allocation13], 4294965248 }
  0xa8   : > { %2686 = dma.done.wait (%p2866_p1), [#allocation16], 2048  }
  0xa9   : > { %2688 = vsyncadd (%p2866_p1), [#allocation16], 4294965248 }
  0xaa   : > { %2690 = dma.done.wait (%p2866_p1), [#allocation19], 2048  }
  0xab   : > { %2692 = vsyncadd (%p2866_p1), [#allocation19], 4294965248  ;;  %v618_v0 = vld [vmem:[%s540_s27] sm:$0xff]  ;;  %s3051_s11 = scalar_lea.vmem [#allocation21], %s1825_s9  ;;  %p1835_p3 = scmp.ne.s32.totalorder %s2711_s16, 0 }
  0xad   : > { %622 = sbr.rel (%p1835_p3) target bundleno = 182 (0xb6), region = 116 }
  0xb2   : > { %vm623_vm0 = vcmask 1043459   ;;  %vm624_vm1 = vsmask.f32 7950  ;;  %v626_v1 = vld [vmem:[#allocation2] sm:$0x8] }
  0xb3   : > { %vm625_vm2 = vmand %vm623_vm0, %vm624_vm1  ;;  %v629_v2 = vld [vmem:[#allocation3] sm:$0x8] }
  0xb4   : > { %v627_v3 = vsel %vm625_vm2, 0, %v626_v1  ;;  %v630_v4 = vsel %vm625_vm2, 0, %v629_v2 }
  0xb5   : > { %628 = vst [vmem:[#allocation2] sm:$0x8] %v627_v3  ;;  %631 = vst [vmem:[#allocation3] sm:$0x8] %v630_v4 }
  0xb6 PF: > { %p1836_p1 = scmp.le.s32.totalorder %s2711_s16, 0 }
  0xb8   : > { %635 = sbr.rel (%p1836_p1) target bundleno = 194 (0xc2), region = 120 }
  0xbd   : > { %v636_v5 = vld [vmem:[#allocation2 + $0x4] sm:$0x8]  ;;  %vm638_vm3 = vcmask 1043459   ;;  %vm639_vm4 = vsmask.f32 7950 }
  0xbe   : > { %vm640_vm5 = vmand %vm638_vm3, %vm639_vm4  ;;  %v641_v6 = vld [vmem:[#allocation2] sm:$0x8]  ;;  %v637_v7 = vld [vmem:[#allocation3 + $0x4] sm:$0x8] }
  0xbf   : > { %v642_v8 = vsel %vm640_vm5, %v636_v5, %v641_v6  ;;  %v644_v9 = vld [vmem:[#allocation3] sm:$0x8] }
  0xc0   : > { %643 = vst [vmem:[#allocation2] sm:$0x8] %v642_v8  ;;  %v645_v10 = vsel %vm640_vm5, %v637_v7, %v644_v9 }
  0xc1   : > { %646 = vst [vmem:[#allocation3] sm:$0x8] %v645_v10 }
  0xc2 PF: > { %v2295_v11 = vld [vmem:[#allocation11 + $0x74] ss:$8 sps:$4 sm:$0xff]   ;;  %v3059_v12 = vpack.c.bf16 %v618_v0, %v618_v0  ;;  %v2742_v13 = vmov 0.0   ;;  %vm2743_vm6 = vmmov 0   ;;  %v2298_v15 = vld [vmem:[#allocation11 + $0x70] ss:$8 sps:$4 sm:$0xff]  }
  0xc3   : > { %1988 = vmatprep.subr.bf16.mxu1 %v2742_v13  ;;  %v2297_v14 = vld [vmem:[#allocation9 + $0x38] sm:$0xff]   ;;  %2004 = vmatprep.mubr.msk.bf16.mxu1 %vm2743_vm6, %v2742_v13  ;;  %v2744_v16 = vmov 0   ;;  %v2299_v17 = vld [vmem:[#allocation11 + $0x64] ss:$8 sps:$4 sm:$0xff]   ;;  %v2301_v18 = vld [vmem:[#allocation9 + $0x30] sm:$0xff]   ;;  %s3261_s1 = sld [smem:[#allocation34_spill]] }
  0xc4   : > { %745 = vmatprep.subr.bf16.mxu0 %v2295_v11  ;;  %777 = vmatprep.mubr.bf16.mxu0 %v2744_v16  ;;  %648 = vst [vmem:[#allocation2 + $0x4] sm:$0xf] %v3059_v12  ;;  %v2302_v19 = vld [vmem:[#allocation11 + $0x60] ss:$8 sps:$4 sm:$0xff]   ;;  %v2303_v20 = vld [vmem:[#allocation11 + $0x54] ss:$8 sps:$4 sm:$0xff]  }
  0xc5   : > { %1989 = vmatpush3.bf16.msra.mxu1 %v2297_v14  ;;  %746 = vmatpush1.bf16.msra.mxu0 %v2298_v15  ;;  %v2305_v21 = vld [vmem:[#allocation9 + $0x28] sm:$0xff]   ;;  %v2306_v22 = vld [vmem:[#allocation11 + $0x50] ss:$8 sps:$4 sm:$0xff]   ;;  %v2309_v24 = vld [vmem:[#allocation9 + $0x20] sm:$0xff]   ;;  %s3262_s14 = sld [smem:[#allocation31_spill]] }
  0xc6   : > { %1990 = vmatprep.subr.bf16.mxu1 %v2742_v13  ;;  %747 = vmatprep.subr.bf16.mxu0 %v2299_v17  ;;  %v2307_v23 = vld [vmem:[#allocation11 + $0x44] ss:$8 sps:$4 sm:$0xff]   ;;  %v2310_v25 = vld [vmem:[#allocation11 + $0x40] ss:$8 sps:$4 sm:$0xff]   ;;  %v2311_v26 = vld [vmem:[#allocation11 + $0x34] ss:$8 sps:$4 sm:$0xff]  }
  0xc7   : > { %v2313_v27 = vld [vmem:[#allocation9 + $0x18] sm:$0xff]   ;;  %v2315_v29 = vld [vmem:[#allocation11 + $0x24] ss:$8 sps:$4 sm:$0xff]   ;;  %v2317_v30 = vld [vmem:[#allocation9 + $0x10] sm:$0xff]  }
  0xc8   : > { %v2314_v28 = vld [vmem:[#allocation11 + $0x30] ss:$8 sps:$4 sm:$0xff]   ;;  %v2318_v31 = vld [vmem:[#allocation11 + $0x20] ss:$8 sps:$4 sm:$0xff]   ;;  %v2319_v33 = vld [vmem:[#allocation11 + $0x14] ss:$8 sps:$4 sm:$0xff]  }
  0xc9   : > { %1991 = vmatpush3.bf16.msra.mxu1 %v2301_v18  ;;  %748 = vmatpush1.bf16.msra.mxu0 %v2302_v19  ;;  %v2321_v34 = vld [vmem:[#allocation9 + $0x8] sm:$0xff]   ;;  %v2322_v37 = vld [vmem:[#allocation11 + $0x10] ss:$8 sps:$4 sm:$0xff]   ;;  %v2325_v39 = vld [vmem:[#allocation9] sm:$0xff]  }
  0xca   : > { %1992 = vmatprep.subr.bf16.mxu1 %v2742_v13  ;;  %749 = vmatprep.subr.bf16.mxu0 %v2303_v20  ;;  %v2323_v38 = vld [vmem:[#allocation11 + $0x4] ss:$8 sps:$4 sm:$0xff]   ;;  %v2326_v42 = vld [vmem:[#allocation11] ss:$8 sps:$4 sm:$0xff]   ;;  %v2328_v43 = vld [vmem:[#allocation14 + $0x38] sm:$0xff]  }
  0xcb   : > { %v2327_v32 = vld [vmem:[#allocation2] sm:$0xf8]   ;;  %v2332_v45 = vld [vmem:[#allocation12 + $0x38] sm:$0xff]   ;;  %v2330_v48 = vld [vmem:[#allocation14 + $0x28] sm:$0xff]  }
  0xcc   : > { %v818_v35 = vshrl.u32 %v2327_v32, 16  ;;  %v821_v36 = vshll.u32 %v2327_v32, 16  ;;  %v2329_v46 = vld [vmem:[#allocation14 + $0x30] sm:$0xff]   ;;  %v2331_v49 = vld [vmem:[#allocation14 + $0x20] sm:$0xff]   ;;  %v2333_v50 = vld [vmem:[#allocation14 + $0x18] sm:$0xff]  }
  0xcd   : > { %1993 = vmatpush3.bf16.msra.mxu1 %v2305_v21  ;;  %750 = vmatpush1.bf16.msra.mxu0 %v2306_v22  ;;  %v2334_v47 = vld [vmem:[#allocation12 + $0x30] sm:$0xff]   ;;  %v2336_v52 = vld [vmem:[#allocation12 + $0x28] sm:$0xff]   ;;  %v2338_v54 = vld [vmem:[#allocation12 + $0x20] sm:$0xff]  }
  0xce   : > { %1994 = vmatprep.subr.bf16.mxu1 %v2742_v13  ;;  %751 = vmatprep.subr.bf16.mxu0 %v2307_v23  ;;  %v820_v40 = vrot.slane %v818_v35, 3  ;;  %v823_v41 = vrot.slane %v821_v36, 4  ;;  %v2335_v51 = vld [vmem:[#allocation14 + $0x10] sm:$0xff]   ;;  %v2337_v53 = vld [vmem:[#allocation14 + $0x8] sm:$0xff]   ;;  %v2339_v55 = vld [vmem:[#allocation14] sm:$0xff]  }
  0xcf   : > { %v2340_v56 = vld [vmem:[#allocation12 + $0x18] sm:$0xff]   ;;  %v2341_v57 = vld [vmem:[#allocation12 + $0x10] sm:$0xff]   ;;  %v2342_v58 = vld [vmem:[#allocation12 + $0x8] sm:$0xff]  }
  0xd0   : > { %v824_v44 = vor.u32 %v823_v41, %v820_v40  ;;  %v2343_v59 = vld [vmem:[#allocation12] sm:$0xff]   ;;  %v1863_v62 = vld [vmem:[%s3208_s3] ss:$0 sm:$0xff] }
  0xd1   : > { %1995 = vmatpush3.bf16.msra.mxu1 %v2309_v24  ;;  %752 = vmatpush1.bf16.msra.mxu0 %v2310_v25  ;;  %v1881_v21 = vld [vmem:[%s3261_s1] ss:$0 sm:$0xff] }
  0xd2   : > { %1996 = vmatprep.subr.bf16.mxu1 %v2742_v13  ;;  %753 = vmatprep.subr.bf16.mxu0 %v2311_v26  ;;  %v1853_v23 = vld [vmem:[%s3262_s14] ss:$0 sm:$0xff] }
  0xd5   : > { %1997 = vmatpush3.bf16.msra.mxu1 %v2313_v27  ;;  %754 = vmatpush1.bf16.msra.mxu0 %v2314_v28 }
  0xd6   : > { %1998 = vmatprep.subr.bf16.mxu1 %v2742_v13  ;;  %755 = vmatprep.subr.bf16.mxu0 %v2315_v29 }
  0xd9   : > { %1999 = vmatpush3.bf16.msra.mxu1 %v2317_v30  ;;  %756 = vmatpush1.bf16.msra.mxu0 %v2318_v31 }
  0xda   : > { %2000 = vmatprep.subr.bf16.mxu1 %v2742_v13  ;;  %757 = vmatprep.subr.bf16.mxu0 %v2319_v33 }
  0xdd   : > { %2001 = vmatpush3.bf16.msra.mxu1 %v2321_v34  ;;  %758 = vmatpush1.bf16.msra.mxu0 %v2322_v37 }
  0xde   : > { %2002 = vmatprep.subr.bf16.mxu1 %v2742_v13  ;;  %759 = vmatprep.subr.bf16.mxu0 %v2323_v38 }
  0xe1   : > { %2003 = vmatpush3.bf16.msra.mxu1 %v2325_v39  ;;  %760 = vmatpush1.bf16.msra.mxu0 %v2326_v42 }
  0xe2   : > { %2028 = vmatprep.subr.bf16.mxu1 %v2742_v13  ;;  %2008 = vmatprep.subr.bf16.mxu0 %v2742_v13 }
  0xe4   : > { %2005 = vmatmul.mubr.bf16.vlgmr.msra.gmra.mxu1 %v824_v44  ;;  %778 = vmatmul.mubr.bf16.vlgmr.msra.gmra.mxu0 %v3059_v12 }
  0xe5   : > { %2029 = vmatpush3.bf16.msra.mxu1 %v2328_v43  ;;  %2009 = vmatpush3.bf16.msra.mxu0 %v2332_v45 }
  0xe6   : > { %2030 = vmatprep.subr.bf16.mxu1 %v2742_v13  ;;  %2010 = vmatprep.subr.bf16.mxu0 %v2742_v13 }
  0xe7   : > { %2044 = vmatprep.mubr.msk.bf16.mxu1 %vm2743_vm6, %v2742_v13  ;;  %2024 = vmatprep.mubr.msk.bf16.mxu0 %vm2743_vm6, %v2742_v13 }
  0xe9   : > { %2031 = vmatpush3.bf16.msra.mxu1 %v2329_v46  ;;  %2011 = vmatpush3.bf16.msra.mxu0 %v2334_v47 }
  0xea   : > { %2032 = vmatprep.subr.bf16.mxu1 %v2742_v13  ;;  %2012 = vmatprep.subr.bf16.mxu0 %v2742_v13 }
  0xed   : > { %2033 = vmatpush3.bf16.msra.mxu1 %v2330_v48  ;;  %2013 = vmatpush3.bf16.msra.mxu0 %v2336_v52 }
  0xee   : > { %2034 = vmatprep.subr.bf16.mxu1 %v2742_v13  ;;  %2014 = vmatprep.subr.bf16.mxu0 %v2742_v13 }
  0xf1   : > { %2035 = vmatpush3.bf16.msra.mxu1 %v2331_v49  ;;  %2015 = vmatpush3.bf16.msra.mxu0 %v2338_v54 }
  0xf2   : > { %2036 = vmatprep.subr.bf16.mxu1 %v2742_v13  ;;  %2016 = vmatprep.subr.bf16.mxu0 %v2742_v13 }
  0xf5   : > { %2037 = vmatpush3.bf16.msra.mxu1 %v2333_v50  ;;  %2017 = vmatpush3.bf16.msra.mxu0 %v2340_v56 }
  0xf6   : > { %2038 = vmatprep.subr.bf16.mxu1 %v2742_v13  ;;  %2018 = vmatprep.subr.bf16.mxu0 %v2742_v13 }
  0xf9   : > { %2039 = vmatpush3.bf16.msra.mxu1 %v2335_v51  ;;  %2019 = vmatpush3.bf16.msra.mxu0 %v2341_v57 }
  0xfa   : > { %2040 = vmatprep.subr.bf16.mxu1 %v2742_v13  ;;  %2020 = vmatprep.subr.bf16.mxu0 %v2742_v13 }
  0xfd   : > { %2041 = vmatpush3.bf16.msra.mxu1 %v2337_v53  ;;  %2021 = vmatpush3.bf16.msra.mxu0 %v2342_v58 }
  0xfe   : > { %2042 = vmatprep.subr.bf16.mxu1 %v2742_v13  ;;  %2022 = vmatprep.subr.bf16.mxu0 %v2742_v13 }
 0x101   : > { %2043 = vmatpush3.bf16.msra.mxu1 %v2339_v55  ;;  %2023 = vmatpush3.bf16.msra.mxu0 %v2343_v59 }
 0x1a4   : > { %v908_v60 = vpop.f32.mrf.mxu1  ;;  %v779_v61 = vpop.f32.mrf.mxu0 }
 0x1a5   : > { %v914_v63 = vadd.f32 %v908_v60, %v779_v61 }
 0x1a6   : > { %v2006_v0 = vpop.f32.mrf.mxu1  ;;  %v781_v1 = vpop.f32.mrf.mxu0 }
 0x1a7   : > { %v922_v2 = vadd.f32 %v1863_v62, %v914_v63  ;;  %v793_v27 = vadd.f32 %v1853_v23, %v781_v1 }
 0x1a8   : > { %v911_v3 = vpop.f32.mrf.mxu1  ;;  %v783_v4 = vpop.f32.mrf.mxu0 }
 0x1a9   : > { %v923_v5 = vmax.f32 %v922_v2, 0.0 }
 0x1aa   : > { %v2007_v6 = vpop.f32.mrf.mxu1  ;;  %v784_v7 = vpop.f32.mrf.mxu0 }
 0x1ab   : > { %v924_v8 = vpack.c.bf16 %v923_v5, %v923_v5 }
 0x1ad   : > { %925 = vst [vmem:[#allocation3 + $0x4] sm:$0xf] %v924_v8  ;;  %2045 = vmatmul.mubr.bf16.vlgmr.msra.gmra.mxu1 %v924_v8 }
 0x1b4   : > { %v2344_v9 = vld [vmem:[#allocation3] sm:$0xf8]  }
 0x1b5   : > { %v966_v10 = vshrl.u32 %v2344_v9, 16  ;;  %v969_v11 = vshll.u32 %v2344_v9, 16 }
 0x1b7   : > { %v968_v12 = vrot.slane %v966_v10, 3  ;;  %v971_v14 = vrot.slane %v969_v11, 4 }
 0x1b9   : > { %v972_v15 = vor.u32 %v971_v14, %v968_v12 }
 0x1bb   : > { %2025 = vmatmul.mubr.bf16.vlgmr.msra.gmra.mxu0 %v972_v15 }
 0x26d   : > { %v1144_v16 = vpop.f32.mrf.mxu1 }
 0x26f   : > { %v2046_v17 = vpop.f32.mrf.mxu1 }
 0x271   : > { %v1147_v18 = vpop.f32.mrf.mxu1 }
 0x273   : > { %v2047_v19 = vpop.f32.mrf.mxu1 }
 0x27b   : > { %v1056_v20 = vpop.f32.mrf.mxu0 }
 0x27c   : > { %v1145_v22 = vadd.f32 %v1144_v16, %v1056_v20 }
 0x27d   : > { %v2026_v24 = vpop.f32.mrf.mxu0 }
 0x27e   : > { %v1157_v25 = vadd.f32 %v1881_v21, %v1145_v22 }
 0x27f   : > { %v1059_v26 = vpop.f32.mrf.mxu0 }
 0x280   : > { %v1158_v28 = vmax.f32 %v1157_v25, 0.0  ;;  %1163 = sbr.rel (%p1835_p3) target bundleno = 647 (0x287), region = 124 }
 0x281   : > { %v2027_v29 = vpop.f32.mrf.mxu0 }
 0x282   : > { %v1159_v30 = vadd.f32 %v1158_v28, %v793_v27 }
 0x284   : > { %v3102_v31 = vmax.f32 %v1159_v30, 0.0 }
 0x285   : > { %v2745_v32 = vmov 0  }
 0x286   : > { %1164 = vst [vmem:[#allocation4] sm:$0x8] %v2745_v32  ;;  %1165 = vst [vmem:[#allocation5] sm:$0x8] %v2745_v32 }
 0x287 PF: > { %1168 = sbr.rel (%p1836_p1) target bundleno = 654 (0x28e), region = 128 }
 0x28c   : > { %v1169_v33 = vld [vmem:[#allocation4 + $0x4] sm:$0x8]  ;;  %v1170_v34 = vld [vmem:[#allocation5 + $0x4] sm:$0x8] }
 0x28d   : > { %1171 = vst [vmem:[#allocation4] sm:$0x8] %v1169_v33  ;;  %1172 = vst [vmem:[#allocation5] sm:$0x8] %v1170_v34 }
 0x28e PF: > { %2048 = vmatprep.subr.bf16.mxu0 %v2742_v13  ;;  %2068 = vmatprep.subr.bf16.mxu1 %v2742_v13  ;;  %v2345_v35 = vld [vmem:[#allocation15 + $0x38] sm:$0xff]   ;;  %v1173_v36 = vpack.c.bf16 %v3102_v31, %v3102_v31  ;;  %v2347_v38 = vld [vmem:[#allocation15 + $0x30] sm:$0xff]   ;;  %v2349_v40 = vld [vmem:[#allocation15 + $0x28] sm:$0xff]   ;;  %s3263_s6 = sld [smem:[#allocation37_spill]]  ;;  %s1648_s17 = sshll.u32 %s3051_s11, 4  ;;  %s1649_s17 = int_to_ptr.vmem [resolvable:$true] %s1648_s17 }
 0x28f   : > { %v2346_v37 = vld [vmem:[#allocation17 + $0x38] sm:$0xff]   ;;  %2064 = vmatprep.mubr.msk.bf16.mxu0 %vm2743_vm6, %v2742_v13  ;;  %2084 = vmatprep.mubr.msk.bf16.mxu1 %vm2743_vm6, %v2742_v13  ;;  %v2348_v39 = vld [vmem:[#allocation17 + $0x30] sm:$0xff]   ;;  %v2350_v41 = vld [vmem:[#allocation17 + $0x28] sm:$0xff]   ;;  %s3264_s4 = sld [smem:[#allocation28_spill]]  ;;  %s1633_s7 = scalar_lea.sflag [#allocation8], %s3027_s8 }
 0x290   : > { %2049 = vmatpush3.bf16.msra.mxu0 %v2345_v35  ;;  %1174 = vst [vmem:[#allocation4 + $0x4] sm:$0xf] %v1173_v36  ;;  %2069 = vmatpush3.bf16.msra.mxu1 %v2346_v37  ;;  %v2351_v42 = vld [vmem:[#allocation15 + $0x20] sm:$0xff]   ;;  %v2353_v44 = vld [vmem:[#allocation15 + $0x18] sm:$0xff]   ;;  %v2355_v46 = vld [vmem:[#allocation15 + $0x10] sm:$0xff]   ;;  %s3265_s27 = sld [smem:[#allocation40_spill]] }
 0x291   : > { %2050 = vmatprep.subr.bf16.mxu0 %v2742_v13  ;;  %2070 = vmatprep.subr.bf16.mxu1 %v2742_v13  ;;  %v2352_v43 = vld [vmem:[#allocation17 + $0x20] sm:$0xff]   ;;  %v2354_v45 = vld [vmem:[#allocation17 + $0x18] sm:$0xff]   ;;  %v2356_v47 = vld [vmem:[#allocation17 + $0x10] sm:$0xff]   ;;  %s3266_s25 = sld [smem:[#allocation41_spill]]  ;;  %s2615_s5 = scalar_lea.vmem %s1649_s17, 128 }
 0x292   : > { %v2357_v49 = vld [vmem:[#allocation15 + $0x8] sm:$0xff]   ;;  %v2359_v51 = vld [vmem:[#allocation15] sm:$0xff]   ;;  %v2365_v54 = vld [vmem:[#allocation18 + $0x38] sm:$0xff]   ;;  %p2616_p7 = scmp.ne.s32.totalorder %s1649_s17, %s2615_s5  ;;  %p3267_p8 = scmp.ne.s32.totalorder %s3257_s28, 0 }
 0x293   : > { %v2358_v50 = vld [vmem:[#allocation17 + $0x8] sm:$0xff]   ;;  %v2360_v52 = vld [vmem:[#allocation17] sm:$0xff]   ;;  %v2362_v55 = vld [vmem:[#allocation20 + $0x38] sm:$0xff]  }
 0x294   : > { %2051 = vmatpush3.bf16.msra.mxu0 %v2347_v38  ;;  %2071 = vmatpush3.bf16.msra.mxu1 %v2348_v39  ;;  %v2367_v56 = vld [vmem:[#allocation18 + $0x30] sm:$0xff]   ;;  %v2369_v58 = vld [vmem:[#allocation18 + $0x28] sm:$0xff]   ;;  %v2366_v60 = vld [vmem:[#allocation20 + $0x20] sm:$0xff]   ;;  %p2617_p10 = pnand %p2616_p7, %p3267_p8 }
 0x295   : > { %2052 = vmatprep.subr.bf16.mxu0 %v2742_v13  ;;  %2072 = vmatprep.subr.bf16.mxu1 %v2742_v13  ;;  %v2363_v57 = vld [vmem:[#allocation20 + $0x30] sm:$0xff]   ;;  %v2364_v59 = vld [vmem:[#allocation20 + $0x28] sm:$0xff]   ;;  %v2368_v61 = vld [vmem:[#allocation20 + $0x18] sm:$0xff]   ;;  %s1921_s12 = sshll.u32 %s3264_s4, 1 }
 0x296   : > { %v2370_v62 = vld [vmem:[#allocation20 + $0x10] sm:$0xff]   ;;  %v2371_v63 = vld [vmem:[#allocation18 + $0x20] sm:$0xff]   ;;  %v2372_v0 = vld [vmem:[#allocation20 + $0x8] sm:$0xff]   ;;  %s1644_s22 = sadd.s32 %s2711_s16, %s1921_s12  ;;  %p2618_p12 = pneg %p2617_p10 }
 0x297   : > { %v2361_v48 = vld [vmem:[#allocation4] sm:$0x78]   ;;  %v2373_v1 = vld [vmem:[#allocation18 + $0x18] sm:$0xff]   ;;  %v2375_v3 = vld [vmem:[#allocation18 + $0x10] sm:$0xff]   ;;  %s1922_s23 = sshll.u32 %s1644_s22, 7  ;;  %s2746_s16 = smov [#allocation21]  }
 0x298   : > { %2053 = vmatpush3.bf16.msra.mxu0 %v2349_v40  ;;  %2073 = vmatpush3.bf16.msra.mxu1 %v2350_v41  ;;  %v1214_v53 = vrot.slane %v2361_v48, 3  ;;  %v2374_v2 = vld [vmem:[#allocation20] sm:$0xff]   ;;  %v2376_v4 = vld [vmem:[#allocation18 + $0x8] sm:$0xff]   ;;  %v1901_v8 = vld [vmem:[%s3263_s6] ss:$0 sm:$0xff]  ;;  %s1646_s14 = scalar_lea.hbm %s3266_s25, %s1922_s23  ;;  %s2619_s6 = sshll.u32 %s2746_s16, 4  ;;  %s2620_s6 = int_to_ptr.vmem [resolvable:$false] %s2619_s6 }
 0x299   : > { %2054 = vmatprep.subr.bf16.mxu0 %v2742_v13  ;;  %2074 = vmatprep.subr.bf16.mxu1 %v2742_v13  ;;  %v2377_v5 = vld [vmem:[#allocation18] sm:$0xff]   ;;  %v1919_v26 = vld [vmem:[%s3265_s27] ss:$0 sm:$0xff]  ;;  %s2621_s4 = scalar_lea.vmem %s2620_s6, 256  ;;  %p2622_p6 = scmp.lt.s32.totalorder %s1649_s17, %s2620_s6 }
 0x29a   : > { %p2623_p13 = scmp.lt.s32.totalorder %s2621_s4, %s2615_s5 }
 0x29c   : > { %2055 = vmatpush3.bf16.msra.mxu0 %v2351_v42  ;;  %2075 = vmatpush3.bf16.msra.mxu1 %v2352_v43  ;;  %p2624_p0 = por %p2623_p13, %p2622_p6 }
 0x29d   : > { %2056 = vmatprep.subr.bf16.mxu0 %v2742_v13  ;;  %2076 = vmatprep.subr.bf16.mxu1 %v2742_v13 }
 0x29e   : > { %p2625_p2 = pnand %p2624_p0, %p2618_p12 }
 0x2a0   : > { %2057 = vmatpush3.bf16.msra.mxu0 %v2353_v44  ;;  %2077 = vmatpush3.bf16.msra.mxu1 %v2354_v45 }
 0x2a1   : > { %2058 = vmatprep.subr.bf16.mxu0 %v2742_v13  ;;  %2078 = vmatprep.subr.bf16.mxu1 %v2742_v13 }
 0x2a4   : > { %2059 = vmatpush3.bf16.msra.mxu0 %v2355_v46  ;;  %2079 = vmatpush3.bf16.msra.mxu1 %v2356_v47 }
 0x2a5   : > { %2060 = vmatprep.subr.bf16.mxu0 %v2742_v13  ;;  %2080 = vmatprep.subr.bf16.mxu1 %v2742_v13 }
 0x2a8   : > { %2061 = vmatpush3.bf16.msra.mxu0 %v2357_v49  ;;  %2081 = vmatpush3.bf16.msra.mxu1 %v2358_v50 }
 0x2a9   : > { %2062 = vmatprep.subr.bf16.mxu0 %v2742_v13  ;;  %2082 = vmatprep.subr.bf16.mxu1 %v2742_v13 }
 0x2ac   : > { %2063 = vmatpush3.bf16.msra.mxu0 %v2359_v51  ;;  %2083 = vmatpush3.bf16.msra.mxu1 %v2360_v52 }
 0x2ad   : > { %2088 = vmatprep.subr.bf16.mxu0 %v2742_v13  ;;  %2108 = vmatprep.subr.bf16.mxu1 %v2742_v13 }
 0x2af   : > { %2065 = vmatmul.mubr.bf16.vlgmr.msra.gmra.mxu0 %v1214_v53  ;;  %2085 = vmatmul.mubr.bf16.vlgmr.msra.gmra.mxu1 %v1173_v36 }
 0x2b0   : > { %2089 = vmatpush3.bf16.msra.mxu0 %v2365_v54  ;;  %2109 = vmatpush3.bf16.msra.mxu1 %v2362_v55 }
 0x2b1   : > { %2090 = vmatprep.subr.bf16.mxu0 %v2742_v13  ;;  %2110 = vmatprep.subr.bf16.mxu1 %v2742_v13 }
 0x2b2   : > { %2124 = vmatprep.mubr.msk.bf16.mxu1 %vm2743_vm6, %v2742_v13  ;;  %2104 = vmatprep.mubr.msk.bf16.mxu0 %vm2743_vm6, %v2742_v13 }
 0x2b4   : > { %2091 = vmatpush3.bf16.msra.mxu0 %v2367_v56  ;;  %2111 = vmatpush3.bf16.msra.mxu1 %v2363_v57 }
 0x2b5   : > { %2092 = vmatprep.subr.bf16.mxu0 %v2742_v13  ;;  %2112 = vmatprep.subr.bf16.mxu1 %v2742_v13 }
 0x2b8   : > { %2093 = vmatpush3.bf16.msra.mxu0 %v2369_v58  ;;  %2113 = vmatpush3.bf16.msra.mxu1 %v2364_v59 }
 0x2b9   : > { %2094 = vmatprep.subr.bf16.mxu0 %v2742_v13  ;;  %2114 = vmatprep.subr.bf16.mxu1 %v2742_v13 }
 0x2bc   : > { %2115 = vmatpush3.bf16.msra.mxu1 %v2366_v60  ;;  %2095 = vmatpush3.bf16.msra.mxu0 %v2371_v63 }
 0x2bd   : > { %2116 = vmatprep.subr.bf16.mxu1 %v2742_v13  ;;  %2096 = vmatprep.subr.bf16.mxu0 %v2742_v13 }
 0x2c0   : > { %2117 = vmatpush3.bf16.msra.mxu1 %v2368_v61  ;;  %2097 = vmatpush3.bf16.msra.mxu0 %v2373_v1 }
 0x2c1   : > { %2118 = vmatprep.subr.bf16.mxu1 %v2742_v13  ;;  %2098 = vmatprep.subr.bf16.mxu0 %v2742_v13 }
 0x2c4   : > { %2119 = vmatpush3.bf16.msra.mxu1 %v2370_v62  ;;  %2099 = vmatpush3.bf16.msra.mxu0 %v2375_v3 }
 0x2c5   : > { %2120 = vmatprep.subr.bf16.mxu1 %v2742_v13  ;;  %2100 = vmatprep.subr.bf16.mxu0 %v2742_v13 }
 0x2c8   : > { %2121 = vmatpush3.bf16.msra.mxu1 %v2372_v0  ;;  %2101 = vmatpush3.bf16.msra.mxu0 %v2376_v4 }
 0x2c9   : > { %2122 = vmatprep.subr.bf16.mxu1 %v2742_v13  ;;  %2102 = vmatprep.subr.bf16.mxu0 %v2742_v13 }
 0x2cc   : > { %2123 = vmatpush3.bf16.msra.mxu1 %v2374_v2  ;;  %2103 = vmatpush3.bf16.msra.mxu0 %v2377_v5 }
 0x36f   : > { %v1298_v6 = vpop.f32.mrf.mxu0  ;;  %v1386_v7 = vpop.f32.mrf.mxu1 }
 0x370   : > { %v1387_v9 = vadd.f32 %v1386_v7, %v1298_v6 }
 0x371   : > { %v2066_v10 = vpop.f32.mrf.mxu0  ;;  %v2086_v11 = vpop.f32.mrf.mxu1 }
 0x372   : > { %v1399_v12 = vadd.f32 %v1901_v8, %v1387_v9 }
 0x373   : > { %v1301_v14 = vpop.f32.mrf.mxu0  ;;  %v1389_v15 = vpop.f32.mrf.mxu1 }
 0x374   : > { %v1400_v16 = vmax.f32 %v1399_v12, 0.0 }
 0x375   : > { %v2067_v17 = vpop.f32.mrf.mxu0  ;;  %v2087_v18 = vpop.f32.mrf.mxu1 }
 0x376   : > { %v1401_v19 = vpack.c.bf16 %v1400_v16, %v1400_v16 }
 0x378   : > { %1402 = vst [vmem:[#allocation5 + $0x4] sm:$0xf] %v1401_v19  ;;  %2125 = vmatmul.mubr.bf16.vlgmr.msra.gmra.mxu1 %v1401_v19 }
 0x37f   : > { %v2378_v13 = vld [vmem:[#allocation5] sm:$0x78]  }
 0x380   : > { %v1442_v20 = vrot.slane %v2378_v13, 3 }
 0x382   : > { %2105 = vmatmul.mubr.bf16.vlgmr.msra.gmra.mxu0 %v1442_v20 }
 0x438   : > { %v1614_v21 = vpop.f32.mrf.mxu1 }
 0x43a   : > { %v2126_v22 = vpop.f32.mrf.mxu1 }
 0x43c   : > { %v1617_v23 = vpop.f32.mrf.mxu1 }
 0x43e   : > { %v2127_v24 = vpop.f32.mrf.mxu1 }
 0x442   : > { %v1526_v25 = vpop.f32.mrf.mxu0 }
 0x443   : > { %v1615_v27 = vadd.f32 %v1614_v21, %v1526_v25 }
 0x444   : > { %v2106_v28 = vpop.f32.mrf.mxu0 }
 0x445   : > { %v1627_v29 = vadd.f32 %v1919_v26, %v1615_v27 }
 0x446   : > { %v1529_v30 = vpop.f32.mrf.mxu0 }
 0x447   : > { %v1628_v32 = vmax.f32 %v1627_v29, 0.0 }
 0x448   : > { %v2107_v33 = vpop.f32.mrf.mxu0 }
 0x449   : > { %v1629_v34 = vadd.f32 %v1628_v32, %v3102_v31 }
 0x44b   : > { %v1630_v35 = vmax.f32 %v1629_v34, 0.0 }
 0x44d   : > { %1631 = vst [vmem:[%s3051_s11] sm:$0xff] %v1630_v35 }
 0x44e   : > { %2628 = shalt.err (!%p2625_p2)
}
 0x44f   : > { %s2629_s9 = scalar_lea.hbm %s1646_s14, 128  ;;  %s2633_s10 = scalar_lea.hbm %s3266_s25, 512 }
 0x450   : > { %p2630_p4 = scmp.ne.s32.totalorder %s1646_s14, %s2629_s9  ;;  %p2634_p11 = scmp.lt.s32.totalorder %s1646_s14, %s3266_s25 }
 0x451   : > { %p2635_p3 = scmp.lt.s32.totalorder %s2633_s10, %s2629_s9 }
 0x452   : > { %p2631_p5 = pnand %p2630_p4, %p3267_p8 }
 0x453   : > { %p2636_p1 = por %p2635_p3, %p2634_p11 }
 0x454   : > { %p2632_p9 = pneg %p2631_p5 }
 0x456   : > { %p2637_p7 = pnand %p2636_p1, %p2632_p9 }
 0x458   : > { %2640 = shalt.err (!%p2637_p7)
}
 0x459   : > { %2162 = dma.vmem_to_hbm [thread:$0]  (%p3267_p8), %s1649_s17, 128, %s1646_s14, %s1633_s7  }
 0x45a PF: > { %p2214_p10 = scmp.ge.s32.totalorder %s2727_s20, 2  ;;  %s1660_s22 = sand.u32 1, %s2699_s29  }
 0x45b   : > { %p3268_p12 = scmp.ne.s32.totalorder %s3259_s24, 0  ;;  %s1661_s23 = scalar_lea.sflag [#allocation8], %s1660_s22 }
 0x45d   : > { %p2194_p6 = pnand %p2214_p10, %p3268_p12 }
 0x45f   : > { %p2195_p13 = pneg %p2194_p6 }
 0x461   : > { %2694 = dma.done.wait (%p2195_p13), %s1661_s23, 128  }
 0x462   : > { %2696 = vsyncadd (%p2195_p13), %s1661_s23, 4294967168  ;;  %s34_s20 = sadd.s32 1, %s2727_s20   ;;  %s3269_s29 = smov %s2703_s30 }
 0x463   : > { %p31_p0 = scmp.ge.s32.totalorder %s34_s20, 6   ;;  %s3270_s30 = smov %s2707_s15 }
 0x464   : > { %s3271_s15 = smov %s3007_s2  ;;  %s3272_s16 = smov %s2719_s18 }
 0x465   : > { %s3273_s17 = smov %s2723_s19  ;;  %s3274_s18 = smov %s3277_s13 }
 0x466   : > { %s3275_s19 = smov %s3281_s26  ;;  %33 = sbr.rel (!%p31_p0) target bundleno = 25 (0x19), region = 169 }
 0x46b   :  { %1666 = vsyncpa [#allocation7], 1 }
 0x46c   :  { %1668 = vsyncpa [#allocation7 + $0x1], 1 }
 0x46d   :  { %1669 = vsyncpa [#allocation10], 1 }
 0x46e   :  { %1670 = vsyncpa [#allocation13], 1 }
 0x46f   :  { %1671 = vsyncpa [#allocation16], 1 }
 0x470   :  { %1672 = vsyncpa [#allocation19], 1 }
 0x471   :  { %1673 = vsyncpa [#allocation8], 1 }
 0x472   :  { %1675 = vsyncpa [#allocation8 + $0x1], 1 }

// kernel: tpu_custom_call.1
= control target key start
LH: loop header
LB: loop body
LE: loop exit
PB: predicated region body
PF: predicated region fallthrough
CT: control target
= control target key end

     0   :  { %s3205_s0 = inlined_call_operand.hbm [shape: f32[2,16,128], index: 0, kind: input, shape index: {}]   ;;  %s3206_s1 = inlined_call_operand.hbm [shape: bf16[1,128,128], index: 1, kind: input, shape index: {}]   ;;  %s3207_s2 = inlined_call_operand.hbm [shape: bf16[128,256], index: 2, kind: input, shape index: {}]   ;;  %s3208_s3 = inlined_call_operand.vmem [shape: f32[1,128], index: 3, kind: input, shape index: {}]   ;;  %s3209_s4 = inlined_call_operand.vmem [shape: f32[1,128], index: 4, kind: input, shape index: {}]   ;;  %s3210_s5 = inlined_call_operand.hbm [shape: bf16[1,128,128], index: 5, kind: input, shape index: {}]   ;;  %s3211_s6 = inlined_call_operand.hbm [shape: bf16[128,128], index: 6, kind: input, shape index: {}]   ;;  %s3212_s7 = inlined_call_operand.vmem [shape: f32[1,128], index: 7, kind: input, shape index: {}]   ;;  %s3213_s8 = inlined_call_operand.hbm [shape: bf16[1,128,128], index: 8, kind: input, shape index: {}]   ;;  %s3214_s9 = inlined_call_operand.hbm [shape: bf16[128,128], index: 9, kind: input, shape index: {}]   ;;  %s3215_s10 = inlined_call_operand.vmem [shape: f32[1,128], index: 10, kind: input, shape index: {}]   ;;  %s3216_s11 = inlined_call_operand.hbm [shape: bf16[1,128,128], index: 11, kind: input, shape index: {}]   ;;  %s3217_s12 = inlined_call_operand.hbm [shape: bf16[128,128], index: 12, kind: input, shape index: {}]   ;;  %s3218_s13 = inlined_call_operand.vmem [shape: f32[1,128], index: 13, kind: input, shape index: {}]   ;;  %s3219_s14 = inlined_call_operand.hbm [shape: f32[2,16,128], index: 14, kind: output, shape index: {}]  }
   0x1   :  { %3227 = sst [smem:[#allocation29_spill]] %s3206_s1 }
   0x2   :  { %3228 = sst [smem:[#allocation30_spill]] %s3207_s2 }
   0x3   :  { %3229 = sst [smem:[#allocation31_spill]] %s3209_s4 }
   0x4   :  { %3230 = sst [smem:[#allocation32_spill]] %s3210_s5 }
   0x5   :  { %3231 = sst [smem:[#allocation33_spill]] %s3211_s6 }
   0x6   :  { %3232 = sst [smem:[#allocation34_spill]] %s3212_s7 }
   0x7   :  { %3233 = sst [smem:[#allocation35_spill]] %s3213_s8 }
   0x8   :  { %3234 = sst [smem:[#allocation36_spill]] %s3214_s9 }
   0x9   :  { %3235 = sst [smem:[#allocation37_spill]] %s3215_s10 }
   0xa   :  { %3236 = sst [smem:[#allocation38_spill]] %s3216_s11 }
   0xb   :  { %3237 = sst [smem:[#allocation39_spill]] %s3217_s12 }
   0xc   :  { %3238 = sst [smem:[#allocation40_spill]] %s3218_s13 }
   0xd   :  { %3239 = sst [smem:[#allocation41_spill]] %s3219_s14 }
   0xe   :  { %19 = vsyncpa [#allocation7], 0 }
   0xf   :  { %21 = vsyncpa [#allocation7 + $0x1], 0 }
  0x10   :  { %22 = vsyncpa [#allocation10], 0 }
  0x11   :  { %23 = vsyncpa [#allocation13], 0 }
  0x12   :  { %24 = vsyncpa [#allocation16], 0 }
  0x13   :  { %25 = vsyncpa [#allocation19], 0 }
  0x14   :  { %26 = vsyncpa [#allocation8], 0 }
  0x15   :  { %28 = vsyncpa [#allocation8 + $0x1], 0  ;;  %s2822_s29 = smov 0   ;;  %s2824_s30 = smov 0  }
  0x16   :  { %s2826_s15 = smov 0   ;;  %s2828_s16 = smov 0  }
  0x17   :  { %s2830_s17 = smov 0   ;;  %s2832_s18 = smov 0  }
  0x18   :  { %s2834_s19 = smov 0   ;;  %s2836_s20 = smov 0  }
  0x19 LB: > { %3240 = sst [smem:[#allocation28_spill]] %s2715_s17  ;;  %s3220_s21 = sadd.s32 4294967295, %s2727_s20   ;;  %s2727_s20 = sphi %s2836_s20, %s34_s20   ;;  %s2723_s19 = sphi %s2834_s19, %s3275_s19   ;;  %s2719_s18 = sphi %s2832_s18, %s3274_s18   ;;  %s2715_s17 = sphi %s2830_s17, %s3273_s17   ;;  %s2711_s16 = sphi %s2828_s16, %s3272_s16   ;;  %s2707_s15 = sphi %s2826_s15, %s3271_s15   ;;  %s2703_s30 = sphi %s2824_s30, %s3270_s30   ;;  %s2699_s29 = sphi %s2822_s29, %s3269_s29  }
  0x1a   : > { %p1811_p0 = scmp.ge.s32.totalorder %s2727_s20, 1  ;;  %p2866_p1 = scmp.eq.s32.totalorder %s3220_s21, 0 }
  0x1b   : > { %p380_p2 = scmp.lt.s32.totalorder %s2727_s20, 5  ;;  %s2729_s24 = smov [#allocation9]  }
  0x1c   : > { %s392_s25 = sshll.u32 %s2729_s24, 4  ;;  %s2730_s27 = smov [#allocation12]   ;;  %s393_s25 = int_to_ptr.vmem [resolvable:$true] %s392_s25 }
  0x1d   : > { %p2871_p3 = pnand %p1811_p0, %p380_p2  ;;  %s424_s28 = sshll.u32 %s2730_s27, 4  ;;  %s425_s28 = int_to_ptr.vmem [resolvable:$true] %s424_s28 }
  0x1e   : > { %s2731_s21 = smov [#allocation15]   ;;  %s2390_s24 = scalar_lea.vmem %s393_s25, 1024 }
  0x1f   : > { %p2164_p4 = pneg %p2871_p3  ;;  %s453_s14 = sshll.u32 %s2731_s21, 4  ;;  %s454_s14 = int_to_ptr.vmem [resolvable:$true] %s453_s14 }
  0x20   : > { %p2391_p7 = scmp.ne.s32.totalorder %s393_s25, %s2390_s24  ;;  %p2398_p10 = scmp.lt.s32.totalorder %s393_s25, %s393_s25 }
  0x21   : > { %p2879_p5 = pnand %p2164_p4, %p2866_p1  ;;  %p2399_p11 = scmp.lt.s32.totalorder %s2390_s24, %s2390_s24 }
  0x23   : > { %p2885_p6 = pneg %p2879_p5  ;;  %p2400_p12 = por %p2399_p11, %p2398_p10 }
  0x25   : > { %p2393_p8 = pnand %p2391_p7, %p2885_p6 }
  0x27   : > { %p2394_p9 = pneg %p2393_p8 }
  0x29   : > { %p2401_p13 = pnand %p2400_p12, %p2394_p9 }
  0x2b   : > { %2404 = shalt.err (!%p2401_p13)
}
  0x2c   : > { %s3222_s27 = smov 64   ;;  %s3224_s21 = smov 4  }
  0x2d   : > { %s3245_s1 = sld [smem:[#allocation29_spill]]  ;;  %s2416_s4 = scalar_lea.vmem %s425_s28, 1024 }
  0x2e   : > { %p2417_p0 = scmp.ne.s32.totalorder %s425_s28, %s2416_s4  ;;  %p2424_p7 = scmp.lt.s32.totalorder %s425_s28, %s425_s28 }
  0x2f   : > { %p2425_p8 = scmp.lt.s32.totalorder %s2416_s4, %s2416_s4 }
  0x30   : > { %p2419_p2 = pnand %p2417_p0, %p2885_p6 }
  0x31   : > { %p2426_p9 = por %p2425_p8, %p2424_p7 }
  0x32   : > { %p2420_p4 = pneg %p2419_p2 }
  0x33   : > { %2167 = dma.hbm_to_vmem [thread:$0]  (!%p2879_p5), %s3245_s1, 1024, %s393_s25, [#allocation10], %s3222_s27, %s3222_s27, %s3224_s21  }
  0x34   : > { %p2427_p10 = pnand %p2426_p9, %p2420_p4 }
  0x36   : > { %2430 = shalt.err (!%p2427_p10)
}
  0x37   : > { %s3246_s5 = sld [smem:[#allocation32_spill]]  ;;  %s2442_s10 = scalar_lea.vmem %s454_s14, 1024 }
  0x38   : > { %p2443_p11 = scmp.ne.s32.totalorder %s454_s14, %s2442_s10  ;;  %p2450_p0 = scmp.lt.s32.totalorder %s454_s14, %s454_s14 }
  0x39   : > { %p2451_p2 = scmp.lt.s32.totalorder %s2442_s10, %s2442_s10 }
  0x3a   : > { %p2445_p12 = pnand %p2443_p11, %p2885_p6 }
  0x3b   : > { %p2452_p4 = por %p2451_p2, %p2450_p0 }
  0x3c   : > { %p2446_p13 = pneg %p2445_p12 }
  0x3d   : > { %2173 = dma.hbm_to_vmem [thread:$0]  (!%p2879_p5), %s3246_s5, 1024, %s425_s28, [#allocation13], %s3222_s27, %s3222_s27, %s3224_s21  }
  0x3e   : > { %p2453_p7 = pnand %p2452_p4, %p2446_p13 }
  0x40   : > { %2456 = shalt.err (!%p2453_p7)
}
  0x41   : > { %s3247_s8 = sld [smem:[#allocation35_spill]]  ;;  %s2734_s17 = smov [#allocation18]  }
  0x42   : > { %s482_s25 = sshll.u32 %s2734_s17, 4  ;;  %s2735_s28 = smov [#allocation11]   ;;  %s483_s25 = int_to_ptr.vmem [resolvable:$true] %s482_s25 }
  0x43   : > { %s405_s24 = sshll.u32 %s2735_s28, 4  ;;  %s2468_s1 = scalar_lea.vmem %s483_s25, 1024  ;;  %s406_s24 = int_to_ptr.vmem [resolvable:$true] %s405_s24 }
  0x44   : > { %p2469_p8 = scmp.ne.s32.totalorder %s483_s25, %s2468_s1  ;;  %p2476_p11 = scmp.lt.s32.totalorder %s483_s25, %s483_s25 }
  0x45   : > { %p2477_p12 = scmp.lt.s32.totalorder %s2468_s1, %s2468_s1 }
  0x46   : > { %p2471_p9 = pnand %p2469_p8, %p2885_p6 }
  0x47   : > { %2179 = dma.hbm_to_vmem [thread:$0]  (!%p2879_p5), %s3247_s8, 1024, %s454_s14, [#allocation16], %s3222_s27, %s3222_s27, %s3224_s21  }
  0x48   : > { %p2472_p10 = pneg %p2471_p9  ;;  %p2478_p13 = por %p2477_p12, %p2476_p11 }
  0x4a   : > { %p2479_p0 = pnand %p2478_p13, %p2472_p10 }
  0x4c   : > { %2482 = shalt.err (!%p2479_p0)
}
  0x4d   : > { %s3248_s11 = sld [smem:[#allocation38_spill]]  ;;  %s2494_s4 = scalar_lea.vmem %s406_s24, 2048 }
  0x4e   : > { %p2495_p2 = scmp.ne.s32.totalorder %s406_s24, %s2494_s4  ;;  %p2502_p8 = scmp.lt.s32.totalorder %s406_s24, %s406_s24 }
  0x4f   : > { %p2503_p9 = scmp.lt.s32.totalorder %s2494_s4, %s2494_s4 }
  0x50   : > { %p2497_p4 = pnand %p2495_p2, %p2885_p6 }
  0x51   : > { %p2504_p10 = por %p2503_p9, %p2502_p8 }
  0x52   : > { %p2498_p7 = pneg %p2497_p4 }
  0x53   : > { %2185 = dma.hbm_to_vmem [thread:$0]  (!%p2879_p5), %s3248_s11, 1024, %s483_s25, [#allocation19], %s3222_s27, %s3222_s27, %s3224_s21  }
  0x54   : > { %p2505_p11 = pnand %p2504_p10, %p2498_p7 }
  0x56   : > { %2508 = shalt.err (!%p2505_p11)
}
  0x57   : > { %s2736_s1 = smov 128   ;;  %s2737_s7 = smov 8  }
  0x58   : > { %s3249_s2 = sld [smem:[#allocation30_spill]]  ;;  %s2738_s25 = smov [#allocation14]  }
  0x59   : > { %s437_s14 = sshll.u32 %s2738_s25, 4  ;;  %s2739_s10 = smov [#allocation17]   ;;  %s438_s14 = int_to_ptr.vmem [resolvable:$true] %s437_s14 }
  0x5a   : > { %s466_s27 = sshll.u32 %s2739_s10, 4  ;;  %s2520_s21 = scalar_lea.vmem %s438_s14, 1024  ;;  %s467_s27 = int_to_ptr.vmem [resolvable:$true] %s466_s27 }
  0x5b   : > { %p2521_p12 = scmp.ne.s32.totalorder %s438_s14, %s2520_s21  ;;  %p2528_p2 = scmp.lt.s32.totalorder %s438_s14, %s438_s14 }
  0x5c   : > { %p2529_p4 = scmp.lt.s32.totalorder %s2520_s21, %s2520_s21 }
  0x5d   : > { %p2523_p13 = pnand %p2521_p12, %p2885_p6 }
  0x5e   : > { %2170 = dma.hbm_to_vmem [thread:$0]  (!%p2879_p5), %s3249_s2, 2048, %s406_s24, [#allocation10], %s2736_s1, %s2736_s1, %s2737_s7  }
  0x5f   : > { %p2524_p0 = pneg %p2523_p13  ;;  %p2530_p7 = por %p2529_p4, %p2528_p2 }
  0x61   : > { %p2531_p8 = pnand %p2530_p7, %p2524_p0 }
  0x63   : > { %2534 = shalt.err (!%p2531_p8)
}
  0x64   : > { %s3250_s4 = smov 4   ;;  %s3251_s17 = smov 64  }
  0x65   : > { %s3252_s6 = sld [smem:[#allocation33_spill]]  ;;  %s2546_s7 = scalar_lea.vmem %s467_s27, 1024 }
  0x66   : > { %p2547_p9 = scmp.ne.s32.totalorder %s467_s27, %s2546_s7  ;;  %p2554_p12 = scmp.lt.s32.totalorder %s467_s27, %s467_s27 }
  0x67   : > { %p2555_p13 = scmp.lt.s32.totalorder %s2546_s7, %s2546_s7 }
  0x68   : > { %p2549_p10 = pnand %p2547_p9, %p2885_p6 }
  0x69   : > { %p2556_p0 = por %p2555_p13, %p2554_p12 }
  0x6a   : > { %p2550_p11 = pneg %p2549_p10 }
  0x6b   : > { %2176 = dma.hbm_to_vmem [thread:$0]  (!%p2879_p5), %s3252_s6, 1024, %s438_s14, [#allocation13], %s3251_s17, %s3251_s17, %s3250_s4  }
  0x6c   : > { %p2557_p2 = pnand %p2556_p0, %p2550_p11 }
  0x6e   : > { %2560 = shalt.err (!%p2557_p2)
}
  0x6f   : > { %s3253_s9 = sld [smem:[#allocation36_spill]]  ;;  %s2740_s25 = smov [#allocation20]  }
  0x70   : > { %s495_s14 = sshll.u32 %s2740_s25, 4  ;;  %s496_s14 = int_to_ptr.vmem [resolvable:$true] %s495_s14 }
  0x71   : > { %s2572_s10 = scalar_lea.vmem %s496_s14, 1024  ;;  %p2580_p9 = scmp.lt.s32.totalorder %s496_s14, %s496_s14 }
  0x72   : > { %p2573_p4 = scmp.ne.s32.totalorder %s496_s14, %s2572_s10  ;;  %p2581_p10 = scmp.lt.s32.totalorder %s2572_s10, %s2572_s10 }
  0x74   : > { %p2575_p7 = pnand %p2573_p4, %p2885_p6  ;;  %p2582_p11 = por %p2581_p10, %p2580_p9 }
  0x75   : > { %2182 = dma.hbm_to_vmem [thread:$0]  (!%p2879_p5), %s3253_s9, 1024, %s467_s27, [#allocation16], %s3251_s17, %s3251_s17, %s3250_s4  }
  0x76   : > { %p2576_p8 = pneg %p2575_p7 }
  0x78   : > { %p2583_p12 = pnand %p2582_p11, %p2576_p8 }
  0x7a   : > { %2586 = shalt.err (!%p2583_p12)
}
  0x7b   : > { %s3254_s12 = sld [smem:[#allocation39_spill]]  ;;  %s43_s13 = sadd.s32 1, %s2719_s18 }
  0x7c   : > { %p44_p6 = scmp.ge.s32.totalorder %s43_s13, 2  ;;  %s46_s26 = sadd.s32 1, %s2723_s19 }
  0x7d   : > { %s1810_s1 = sadd.s32 4294967294, %s2727_s20   ;;  %s55_s7 = sadd.s32 1, %s2707_s15 }
  0x7e   : > { %s3277_s13 = smov (%p44_p6, %s43_s13), 0  ;;  %s3279_s26 = smov (!%p44_p6, %s46_s26), %s2723_s19 }
  0x7f   : > { %s51_s21 = ssub.s32 %s2719_s18, %s3277_s13  ;;  %p62_p13 = scmp.ne.s32.totalorder %s2707_s15, %s2703_s30 }
  0x80   : > { %p48_p0 = scmp.ge.s32.totalorder %s3279_s26, 2  ;;  %p68_p2 = scmp.ne.s32.totalorder %s2703_s30, %s2699_s29 }
  0x81   : > { %2188 = dma.hbm_to_vmem [thread:$0]  (!%p2879_p5), %s3254_s12, 1024, %s496_s14, [#allocation19], %s3251_s17, %s3251_s17, %s3250_s4  }
  0x82   : > { %p63_p4 = scmp.eq.s32.totalorder %s2727_s20, 0  ;;  %s3255_s4 = sadd.s32 4294967295, %s2727_s20  }
  0x83   : > { %p367_p5 = scmp.eq.s32.totalorder %s3255_s4, 3  ;;  %s3281_s26 = smov (%p48_p0, %s3279_s26), 0 }
  0x84   : > { %p2986_p7 = por %p2866_p1, %p68_p2  ;;  %s50_s25 = ssub.s32 %s2723_s19, %s3281_s26 }
  0x85   : > { %p2990_p8 = por %p367_p5, %p62_p13  ;;  %p373_p9 = scmp.eq.s32.totalorder %s1810_s1, 3 }
  0x86   : > { %s52_s14 = sor.u32 %s51_s21, %s50_s25  ;;  %p2996_p10 = por %p63_p4, %p62_p13 }
  0x87   : > { %s3257_s28 = scalar_select %p2990_p8, 1, 0 }
  0x88   : > { %p53_p11 = scmp.eq.s32.totalorder %s52_s14, 0  ;;  %p3000_p12 = por %p373_p9, %p68_p2 }
  0x89   : > { %s512_s27 = sand.u32 1, %s2707_s15   ;;  %s1822_s4 = sshll.u32 %s2723_s19, 1 }
  0x8a   : > { %s3259_s24 = scalar_select %p3000_p12, 1, 0 }
  0x8b   : > { %s3007_s2 = scalar_select %p53_p11, %s2707_s15, %s55_s7  }
  0x8c   : > { %p2205_p6 = scmp.lt.s32.totalorder %s2727_s20, 4  ;;  %s1821_s5 = sshll.u32 %s512_s27, 3 }
  0x8d   : > { %s521_s6 = sadd.s32 %s2719_s18, %s1822_s4  ;;  %s516_s1 = scalar_lea.vmem [#allocation6], %s1821_s5 }
  0x8e   : > { %s1823_s8 = sshll.u32 %s521_s6, 7  ;;  %s525_s21 = sshll.u32 %s516_s1, 4  ;;  %s526_s21 = int_to_ptr.vmem [resolvable:$true] %s525_s21 }
  0x8f   : > { %s523_s11 = scalar_lea.hbm %s3205_s0, %s1823_s8  ;;  %p3016_p13 = pnand %p2205_p6, %p2996_p10 }
  0x90   : > { %s513_s12 = scalar_lea.sflag [#allocation7], %s512_s27  ;;  %s2600_s7 = scalar_lea.vmem %s526_s21, 128 }
  0x91   : > { %p2589_p0 = pneg %p3016_p13  ;;  %p2601_p2 = scmp.ne.s32.totalorder %s526_s21, %s2600_s7 }
  0x92   : > { %s2741_s5 = smov [#allocation6]  }
  0x93   : > { %p2603_p4 = pnand %p2601_p2, %p2589_p0  ;;  %s2605_s6 = sshll.u32 %s2741_s5, 4  ;;  %s2606_s6 = int_to_ptr.vmem [resolvable:$false] %s2605_s6 }
  0x94   : > { %s2607_s4 = scalar_lea.vmem %s2606_s6, 256  ;;  %p2608_p9 = scmp.lt.s32.totalorder %s526_s21, %s2606_s6 }
  0x95   : > { %p2604_p5 = pneg %p2603_p4  ;;  %p2609_p11 = scmp.lt.s32.totalorder %s2607_s4, %s2600_s7 }
  0x97   : > { %p2610_p12 = por %p2609_p11, %p2608_p9 }
  0x99   : > { %p2611_p8 = pnand %p2610_p12, %p2604_p5 }
  0x9b   : > { %2614 = shalt.err (!%p2611_p8)
}
  0x9c   : > { %2192 = dma.hbm_to_vmem [thread:$0]  (!%p3016_p13), %s523_s11, 128, %s526_s21, %s513_s12  }
  0x9d   : > { %534 = sbr.rel (%p2871_p3) target bundleno = 1114 (0x45a), region = 76  ;;  %s3027_s8 = sand.u32 (!%p2871_p3), 1, %s2703_s30  }
  0x9e   : > { %s1825_s9 = sshll.u32 (!%p2871_p3), %s3027_s8, 3  ;;  %s537_s10 = scalar_lea.sflag (!%p2871_p3), [#allocation7], %s3027_s8 }
  0x9f   : > { %s540_s27 = scalar_lea.vmem (!%p2871_p3), [#allocation6], %s1825_s9 }
  0xa2   : > { %2674 = dma.done.wait (%p2986_p7), %s537_s10, 128  }
  0xa3   : > { %2676 = vsyncadd (%p2986_p7), %s537_s10, 4294967168 }
  0xa4   : > { %2678 = dma.done.wait (%p2866_p1), [#allocation10], 3072  }
  0xa5   : > { %2680 = vsyncadd (%p2866_p1), [#allocation10], 4294964224 }
  0xa6   : > { %2682 = dma.done.wait (%p2866_p1), [#allocation13], 2048  }
  0xa7   : > { %2684 = vsyncadd (%p2866_p1), [#allocation13], 4294965248 }
  0xa8   : > { %2686 = dma.done.wait (%p2866_p1), [#allocation16], 2048  }
  0xa9   : > { %2688 = vsyncadd (%p2866_p1), [#allocation16], 4294965248 }
  0xaa   : > { %2690 = dma.done.wait (%p2866_p1), [#allocation19], 2048  }
  0xab   : > { %2692 = vsyncadd (%p2866_p1), [#allocation19], 4294965248  ;;  %v618_v0 = vld [vmem:[%s540_s27] sm:$0xff]  ;;  %s3051_s11 = scalar_lea.vmem [#allocation21], %s1825_s9  ;;  %p1835_p3 = scmp.ne.s32.totalorder %s2711_s16, 0 }
  0xad   : > { %622 = sbr.rel (%p1835_p3) target bundleno = 182 (0xb6), region = 116 }
  0xb2   : > { %vm623_vm0 = vcmask 1043459   ;;  %vm624_vm1 = vsmask.f32 7950  ;;  %v626_v1 = vld [vmem:[#allocation2] sm:$0x8] }
  0xb3   : > { %vm625_vm2 = vmand %vm623_vm0, %vm624_vm1  ;;  %v629_v2 = vld [vmem:[#allocation3] sm:$0x8] }
  0xb4   : > { %v627_v3 = vsel %vm625_vm2, 0, %v626_v1  ;;  %v630_v4 = vsel %vm625_vm2, 0, %v629_v2 }
  0xb5   : > { %628 = vst [vmem:[#allocation2] sm:$0x8] %v627_v3  ;;  %631 = vst [vmem:[#allocation3] sm:$0x8] %v630_v4 }
  0xb6 PF: > { %p1836_p1 = scmp.le.s32.totalorder %s2711_s16, 0 }
  0xb8   : > { %635 = sbr.rel (%p1836_p1) target bundleno = 194 (0xc2), region = 120 }
  0xbd   : > { %v636_v5 = vld [vmem:[#allocation2 + $0x4] sm:$0x8]  ;;  %vm638_vm3 = vcmask 1043459   ;;  %vm639_vm4 = vsmask.f32 7950 }
  0xbe   : > { %vm640_vm5 = vmand %vm638_vm3, %vm639_vm4  ;;  %v641_v6 = vld [vmem:[#allocation2] sm:$0x8]  ;;  %v637_v7 = vld [vmem:[#allocation3 + $0x4] sm:$0x8] }
  0xbf   : > { %v642_v8 = vsel %vm640_vm5, %v636_v5, %v641_v6  ;;  %v644_v9 = vld [vmem:[#allocation3] sm:$0x8] }
  0xc0   : > { %643 = vst [vmem:[#allocation2] sm:$0x8] %v642_v8  ;;  %v645_v10 = vsel %vm640_vm5, %v637_v7, %v644_v9 }
  0xc1   : > { %646 = vst [vmem:[#allocation3] sm:$0x8] %v645_v10 }
  0xc2 PF: > { %v2295_v11 = vld [vmem:[#allocation11 + $0x74] ss:$8 sps:$4 sm:$0xff]   ;;  %v3059_v12 = vpack.c.bf16 %v618_v0, %v618_v0  ;;  %v2742_v13 = vmov 0.0   ;;  %vm2743_vm6 = vmmov 0   ;;  %v2298_v15 = vld [vmem:[#allocation11 + $0x70] ss:$8 sps:$4 sm:$0xff]  }
  0xc3   : > { %1988 = vmatprep.subr.bf16.mxu1 %v2742_v13  ;;  %v2297_v14 = vld [vmem:[#allocation9 + $0x38] sm:$0xff]   ;;  %2004 = vmatprep.mubr.msk.bf16.mxu1 %vm2743_vm6, %v2742_v13  ;;  %v2744_v16 = vmov 0   ;;  %v2299_v17 = vld [vmem:[#allocation11 + $0x64] ss:$8 sps:$4 sm:$0xff]   ;;  %v2301_v18 = vld [vmem:[#allocation9 + $0x30] sm:$0xff]   ;;  %s3261_s1 = sld [smem:[#allocation34_spill]] }
  0xc4   : > { %745 = vmatprep.subr.bf16.mxu0 %v2295_v11  ;;  %777 = vmatprep.mubr.bf16.mxu0 %v2744_v16  ;;  %648 = vst [vmem:[#allocation2 + $0x4] sm:$0xf] %v3059_v12  ;;  %v2302_v19 = vld [vmem:[#allocation11 + $0x60] ss:$8 sps:$4 sm:$0xff]   ;;  %v2303_v20 = vld [vmem:[#allocation11 + $0x54] ss:$8 sps:$4 sm:$0xff]  }
  0xc5   : > { %1989 = vmatpush3.bf16.msra.mxu1 %v2297_v14  ;;  %746 = vmatpush1.bf16.msra.mxu0 %v2298_v15  ;;  %v2305_v21 = vld [vmem:[#allocation9 + $0x28] sm:$0xff]   ;;  %v2306_v22 = vld [vmem:[#allocation11 + $0x50] ss:$8 sps:$4 sm:$0xff]   ;;  %v2309_v24 = vld [vmem:[#allocation9 + $0x20] sm:$0xff]   ;;  %s3262_s14 = sld [smem:[#allocation31_spill]] }
  0xc6   : > { %1990 = vmatprep.subr.bf16.mxu1 %v2742_v13  ;;  %747 = vmatprep.subr.bf16.mxu0 %v2299_v17  ;;  %v2307_v23 = vld [vmem:[#allocation11 + $0x44] ss:$8 sps:$4 sm:$0xff]   ;;  %v2310_v25 = vld [vmem:[#allocation11 + $0x40] ss:$8 sps:$4 sm:$0xff]   ;;  %v2311_v26 = vld [vmem:[#allocation11 + $0x34] ss:$8 sps:$4 sm:$0xff]  }
  0xc7   : > { %v2313_v27 = vld [vmem:[#allocation9 + $0x18] sm:$0xff]   ;;  %v2315_v29 = vld [vmem:[#allocation11 + $0x24] ss:$8 sps:$4 sm:$0xff]   ;;  %v2317_v30 = vld [vmem:[#allocation9 + $0x10] sm:$0xff]  }
  0xc8   : > { %v2314_v28 = vld [vmem:[#allocation11 + $0x30] ss:$8 sps:$4 sm:$0xff]   ;;  %v2318_v31 = vld [vmem:[#allocation11 + $0x20] ss:$8 sps:$4 sm:$0xff]   ;;  %v2319_v33 = vld [vmem:[#allocation11 + $0x14] ss:$8 sps:$4 sm:$0xff]  }
  0xc9   : > { %1991 = vmatpush3.bf16.msra.mxu1 %v2301_v18  ;;  %748 = vmatpush1.bf16.msra.mxu0 %v2302_v19  ;;  %v2321_v34 = vld [vmem:[#allocation9 + $0x8] sm:$0xff]   ;;  %v2322_v37 = vld [vmem:[#allocation11 + $0x10] ss:$8 sps:$4 sm:$0xff]   ;;  %v2325_v39 = vld [vmem:[#allocation9] sm:$0xff]  }
  0xca   : > { %1992 = vmatprep.subr.bf16.mxu1 %v2742_v13  ;;  %749 = vmatprep.subr.bf16.mxu0 %v2303_v20  ;;  %v2323_v38 = vld [vmem:[#allocation11 + $0x4] ss:$8 sps:$4 sm:$0xff]   ;;  %v2326_v42 = vld [vmem:[#allocation11] ss:$8 sps:$4 sm:$0xff]   ;;  %v2328_v43 = vld [vmem:[#allocation14 + $0x38] sm:$0xff]  }
  0xcb   : > { %v2327_v32 = vld [vmem:[#allocation2] sm:$0xf8]   ;;  %v2332_v45 = vld [vmem:[#allocation12 + $0x38] sm:$0xff]   ;;  %v2330_v48 = vld [vmem:[#allocation14 + $0x28] sm:$0xff]  }
  0xcc   : > { %v818_v35 = vshrl.u32 %v2327_v32, 16  ;;  %v821_v36 = vshll.u32 %v2327_v32, 16  ;;  %v2329_v46 = vld [vmem:[#allocation14 + $0x30] sm:$0xff]   ;;  %v2331_v49 = vld [vmem:[#allocation14 + $0x20] sm:$0xff]   ;;  %v2333_v50 = vld [vmem:[#allocation14 + $0x18] sm:$0xff]  }
  0xcd   : > { %1993 = vmatpush3.bf16.msra.mxu1 %v2305_v21  ;;  %750 = vmatpush1.bf16.msra.mxu0 %v2306_v22  ;;  %v2334_v47 = vld [vmem:[#allocation12 + $0x30] sm:$0xff]   ;;  %v2336_v52 = vld [vmem:[#allocation12 + $0x28] sm:$0xff]   ;;  %v2338_v54 = vld [vmem:[#allocation12 + $0x20] sm:$0xff]  }
  0xce   : > { %1994 = vmatprep.subr.bf16.mxu1 %v2742_v13  ;;  %751 = vmatprep.subr.bf16.mxu0 %v2307_v23  ;;  %v820_v40 = vrot.slane %v818_v35, 3  ;;  %v823_v41 = vrot.slane %v821_v36, 4  ;;  %v2335_v51 = vld [vmem:[#allocation14 + $0x10] sm:$0xff]   ;;  %v2337_v53 = vld [vmem:[#allocation14 + $0x8] sm:$0xff]   ;;  %v2339_v55 = vld [vmem:[#allocation14] sm:$0xff]  }
  0xcf   : > { %v2340_v56 = vld [vmem:[#allocation12 + $0x18] sm:$0xff]   ;;  %v2341_v57 = vld [vmem:[#allocation12 + $0x10] sm:$0xff]   ;;  %v2342_v58 = vld [vmem:[#allocation12 + $0x8] sm:$0xff]  }
  0xd0   : > { %v824_v44 = vor.u32 %v823_v41, %v820_v40  ;;  %v2343_v59 = vld [vmem:[#allocation12] sm:$0xff]   ;;  %v1863_v62 = vld [vmem:[%s3208_s3] ss:$0 sm:$0xff] }
  0xd1   : > { %1995 = vmatpush3.bf16.msra.mxu1 %v2309_v24  ;;  %752 = vmatpush1.bf16.msra.mxu0 %v2310_v25  ;;  %v1881_v21 = vld [vmem:[%s3261_s1] ss:$0 sm:$0xff] }
  0xd2   : > { %1996 = vmatprep.subr.bf16.mxu1 %v2742_v13  ;;  %753 = vmatprep.subr.bf16.mxu0 %v2311_v26  ;;  %v1853_v23 = vld [vmem:[%s3262_s14] ss:$0 sm:$0xff] }
  0xd5   : > { %1997 = vmatpush3.bf16.msra.mxu1 %v2313_v27  ;;  %754 = vmatpush1.bf16.msra.mxu0 %v2314_v28 }
  0xd6   : > { %1998 = vmatprep.subr.bf16.mxu1 %v2742_v13  ;;  %755 = vmatprep.subr.bf16.mxu0 %v2315_v29 }
  0xd9   : > { %1999 = vmatpush3.bf16.msra.mxu1 %v2317_v30  ;;  %756 = vmatpush1.bf16.msra.mxu0 %v2318_v31 }
  0xda   : > { %2000 = vmatprep.subr.bf16.mxu1 %v2742_v13  ;;  %757 = vmatprep.subr.bf16.mxu0 %v2319_v33 }
  0xdd   : > { %2001 = vmatpush3.bf16.msra.mxu1 %v2321_v34  ;;  %758 = vmatpush1.bf16.msra.mxu0 %v2322_v37 }
  0xde   : > { %2002 = vmatprep.subr.bf16.mxu1 %v2742_v13  ;;  %759 = vmatprep.subr.bf16.mxu0 %v2323_v38 }
  0xe1   : > { %2003 = vmatpush3.bf16.msra.mxu1 %v2325_v39  ;;  %760 = vmatpush1.bf16.msra.mxu0 %v2326_v42 }
  0xe2   : > { %2028 = vmatprep.subr.bf16.mxu1 %v2742_v13  ;;  %2008 = vmatprep.subr.bf16.mxu0 %v2742_v13 }
  0xe4   : > { %2005 = vmatmul.mubr.bf16.vlgmr.msra.gmra.mxu1 %v824_v44  ;;  %778 = vmatmul.mubr.bf16.vlgmr.msra.gmra.mxu0 %v3059_v12 }
  0xe5   : > { %2029 = vmatpush3.bf16.msra.mxu1 %v2328_v43  ;;  %2009 = vmatpush3.bf16.msra.mxu0 %v2332_v45 }
  0xe6   : > { %2030 = vmatprep.subr.bf16.mxu1 %v2742_v13  ;;  %2010 = vmatprep.subr.bf16.mxu0 %v2742_v13 }
  0xe7   : > { %2044 = vmatprep.mubr.msk.bf16.mxu1 %vm2743_vm6, %v2742_v13  ;;  %2024 = vmatprep.mubr.msk.bf16.mxu0 %vm2743_vm6, %v2742_v13 }
  0xe9   : > { %2031 = vmatpush3.bf16.msra.mxu1 %v2329_v46  ;;  %2011 = vmatpush3.bf16.msra.mxu0 %v2334_v47 }
  0xea   : > { %2032 = vmatprep.subr.bf16.mxu1 %v2742_v13  ;;  %2012 = vmatprep.subr.bf16.mxu0 %v2742_v13 }
  0xed   : > { %2033 = vmatpush3.bf16.msra.mxu1 %v2330_v48  ;;  %2013 = vmatpush3.bf16.msra.mxu0 %v2336_v52 }
  0xee   : > { %2034 = vmatprep.subr.bf16.mxu1 %v2742_v13  ;;  %2014 = vmatprep.subr.bf16.mxu0 %v2742_v13 }
  0xf1   : > { %2035 = vmatpush3.bf16.msra.mxu1 %v2331_v49  ;;  %2015 = vmatpush3.bf16.msra.mxu0 %v2338_v54 }
  0xf2   : > { %2036 = vmatprep.subr.bf16.mxu1 %v2742_v13  ;;  %2016 = vmatprep.subr.bf16.mxu0 %v2742_v13 }
  0xf5   : > { %2037 = vmatpush3.bf16.msra.mxu1 %v2333_v50  ;;  %2017 = vmatpush3.bf16.msra.mxu0 %v2340_v56 }
  0xf6   : > { %2038 = vmatprep.subr.bf16.mxu1 %v2742_v13  ;;  %2018 = vmatprep.subr.bf16.mxu0 %v2742_v13 }
  0xf9   : > { %2039 = vmatpush3.bf16.msra.mxu1 %v2335_v51  ;;  %2019 = vmatpush3.bf16.msra.mxu0 %v2341_v57 }
  0xfa   : > { %2040 = vmatprep.subr.bf16.mxu1 %v2742_v13  ;;  %2020 = vmatprep.subr.bf16.mxu0 %v2742_v13 }
  0xfd   : > { %2041 = vmatpush3.bf16.msra.mxu1 %v2337_v53  ;;  %2021 = vmatpush3.bf16.msra.mxu0 %v2342_v58 }
  0xfe   : > { %2042 = vmatprep.subr.bf16.mxu1 %v2742_v13  ;;  %2022 = vmatprep.subr.bf16.mxu0 %v2742_v13 }
 0x101   : > { %2043 = vmatpush3.bf16.msra.mxu1 %v2339_v55  ;;  %2023 = vmatpush3.bf16.msra.mxu0 %v2343_v59 }
 0x1a4   : > { %v908_v60 = vpop.f32.mrf.mxu1  ;;  %v779_v61 = vpop.f32.mrf.mxu0 }
 0x1a5   : > { %v914_v63 = vadd.f32 %v908_v60, %v779_v61 }
 0x1a6   : > { %v2006_v0 = vpop.f32.mrf.mxu1  ;;  %v781_v1 = vpop.f32.mrf.mxu0 }
 0x1a7   : > { %v922_v2 = vadd.f32 %v1863_v62, %v914_v63  ;;  %v793_v27 = vadd.f32 %v1853_v23, %v781_v1 }
 0x1a8   : > { %v911_v3 = vpop.f32.mrf.mxu1  ;;  %v783_v4 = vpop.f32.mrf.mxu0 }
 0x1a9   : > { %v923_v5 = vmax.f32 %v922_v2, 0.0 }
 0x1aa   : > { %v2007_v6 = vpop.f32.mrf.mxu1  ;;  %v784_v7 = vpop.f32.mrf.mxu0 }
 0x1ab   : > { %v924_v8 = vpack.c.bf16 %v923_v5, %v923_v5 }
 0x1ad   : > { %925 = vst [vmem:[#allocation3 + $0x4] sm:$0xf] %v924_v8  ;;  %2045 = vmatmul.mubr.bf16.vlgmr.msra.gmra.mxu1 %v924_v8 }
 0x1b4   : > { %v2344_v9 = vld [vmem:[#allocation3] sm:$0xf8]  }
 0x1b5   : > { %v966_v10 = vshrl.u32 %v2344_v9, 16  ;;  %v969_v11 = vshll.u32 %v2344_v9, 16 }
 0x1b7   : > { %v968_v12 = vrot.slane %v966_v10, 3  ;;  %v971_v14 = vrot.slane %v969_v11, 4 }
 0x1b9   : > { %v972_v15 = vor.u32 %v971_v14, %v968_v12 }
 0x1bb   : > { %2025 = vmatmul.mubr.bf16.vlgmr.msra.gmra.mxu0 %v972_v15 }
 0x26d   : > { %v1144_v16 = vpop.f32.mrf.mxu1 }
 0x26f   : > { %v2046_v17 = vpop.f32.mrf.mxu1 }
 0x271   : > { %v1147_v18 = vpop.f32.mrf.mxu1 }
 0x273   : > { %v2047_v19 = vpop.f32.mrf.mxu1 }
 0x27b   : > { %v1056_v20 = vpop.f32.mrf.mxu0 }
 0x27c   : > { %v1145_v22 = vadd.f32 %v1144_v16, %v1056_v20 }
 0x27d   : > { %v2026_v24 = vpop.f32.mrf.mxu0 }
 0x27e   : > { %v1157_v25 = vadd.f32 %v1881_v21, %v1145_v22 }
 0x27f   : > { %v1059_v26 = vpop.f32.mrf.mxu0 }
 0x280   : > { %v1158_v28 = vmax.f32 %v1157_v25, 0.0  ;;  %1163 = sbr.rel (%p1835_p3) target bundleno = 647 (0x287), region = 124 }
 0x281   : > { %v2027_v29 = vpop.f32.mrf.mxu0 }
 0x282   : > { %v1159_v30 = vadd.f32 %v1158_v28, %v793_v27 }
 0x284   : > { %v3102_v31 = vmax.f32 %v1159_v30, 0.0 }
 0x285   : > { %v2745_v32 = vmov 0  }
 0x286   : > { %1164 = vst [vmem:[#allocation4] sm:$0x8] %v2745_v32  ;;  %1165 = vst [vmem:[#allocation5] sm:$0x8] %v2745_v32 }
 0x287 PF: > { %1168 = sbr.rel (%p1836_p1) target bundleno = 654 (0x28e), region = 128 }
 0x28c   : > { %v1169_v33 = vld [vmem:[#allocation4 + $0x4] sm:$0x8]  ;;  %v1170_v34 = vld [vmem:[#allocation5 + $0x4] sm:$0x8] }
 0x28d   : > { %1171 = vst [vmem:[#allocation4] sm:$0x8] %v1169_v33  ;;  %1172 = vst [vmem:[#allocation5] sm:$0x8] %v1170_v34 }
 0x28e PF: > { %2048 = vmatprep.subr.bf16.mxu0 %v2742_v13  ;;  %2068 = vmatprep.subr.bf16.mxu1 %v2742_v13  ;;  %v2345_v35 = vld [vmem:[#allocation15 + $0x38] sm:$0xff]   ;;  %v1173_v36 = vpack.c.bf16 %v3102_v31, %v3102_v31  ;;  %v2347_v38 = vld [vmem:[#allocation15 + $0x30] sm:$0xff]   ;;  %v2349_v40 = vld [vmem:[#allocation15 + $0x28] sm:$0xff]   ;;  %s3263_s6 = sld [smem:[#allocation37_spill]]  ;;  %s1648_s17 = sshll.u32 %s3051_s11, 4  ;;  %s1649_s17 = int_to_ptr.vmem [resolvable:$true] %s1648_s17 }
 0x28f   : > { %v2346_v37 = vld [vmem:[#allocation17 + $0x38] sm:$0xff]   ;;  %2064 = vmatprep.mubr.msk.bf16.mxu0 %vm2743_vm6, %v2742_v13  ;;  %2084 = vmatprep.mubr.msk.bf16.mxu1 %vm2743_vm6, %v2742_v13  ;;  %v2348_v39 = vld [vmem:[#allocation17 + $0x30] sm:$0xff]   ;;  %v2350_v41 = vld [vmem:[#allocation17 + $0x28] sm:$0xff]   ;;  %s3264_s4 = sld [smem:[#allocation28_spill]]  ;;  %s1633_s7 = scalar_lea.sflag [#allocation8], %s3027_s8 }
 0x290   : > { %2049 = vmatpush3.bf16.msra.mxu0 %v2345_v35  ;;  %1174 = vst [vmem:[#allocation4 + $0x4] sm:$0xf] %v1173_v36  ;;  %2069 = vmatpush3.bf16.msra.mxu1 %v2346_v37  ;;  %v2351_v42 = vld [vmem:[#allocation15 + $0x20] sm:$0xff]   ;;  %v2353_v44 = vld [vmem:[#allocation15 + $0x18] sm:$0xff]   ;;  %v2355_v46 = vld [vmem:[#allocation15 + $0x10] sm:$0xff]   ;;  %s3265_s27 = sld [smem:[#allocation40_spill]] }
 0x291   : > { %2050 = vmatprep.subr.bf16.mxu0 %v2742_v13  ;;  %2070 = vmatprep.subr.bf16.mxu1 %v2742_v13  ;;  %v2352_v43 = vld [vmem:[#allocation17 + $0x20] sm:$0xff]   ;;  %v2354_v45 = vld [vmem:[#allocation17 + $0x18] sm:$0xff]   ;;  %v2356_v47 = vld [vmem:[#allocation17 + $0x10] sm:$0xff]   ;;  %s3266_s25 = sld [smem:[#allocation41_spill]]  ;;  %s2615_s5 = scalar_lea.vmem %s1649_s17, 128 }
 0x292   : > { %v2357_v49 = vld [vmem:[#allocation15 + $0x8] sm:$0xff]   ;;  %v2359_v51 = vld [vmem:[#allocation15] sm:$0xff]   ;;  %v2365_v54 = vld [vmem:[#allocation18 + $0x38] sm:$0xff]   ;;  %p2616_p7 = scmp.ne.s32.totalorder %s1649_s17, %s2615_s5  ;;  %p3267_p8 = scmp.ne.s32.totalorder %s3257_s28, 0 }
 0x293   : > { %v2358_v50 = vld [vmem:[#allocation17 + $0x8] sm:$0xff]   ;;  %v2360_v52 = vld [vmem:[#allocation17] sm:$0xff]   ;;  %v2362_v55 = vld [vmem:[#allocation20 + $0x38] sm:$0xff]  }
 0x294   : > { %2051 = vmatpush3.bf16.msra.mxu0 %v2347_v38  ;;  %2071 = vmatpush3.bf16.msra.mxu1 %v2348_v39  ;;  %v2367_v56 = vld [vmem:[#allocation18 + $0x30] sm:$0xff]   ;;  %v2369_v58 = vld [vmem:[#allocation18 + $0x28] sm:$0xff]   ;;  %v2366_v60 = vld [vmem:[#allocation20 + $0x20] sm:$0xff]   ;;  %p2617_p10 = pnand %p2616_p7, %p3267_p8 }
 0x295   : > { %2052 = vmatprep.subr.bf16.mxu0 %v2742_v13  ;;  %2072 = vmatprep.subr.bf16.mxu1 %v2742_v13  ;;  %v2363_v57 = vld [vmem:[#allocation20 + $0x30] sm:$0xff]   ;;  %v2364_v59 = vld [vmem:[#allocation20 + $0x28] sm:$0xff]   ;;  %v2368_v61 = vld [vmem:[#allocation20 + $0x18] sm:$0xff]   ;;  %s1921_s12 = sshll.u32 %s3264_s4, 1 }
 0x296   : > { %v2370_v62 = vld [vmem:[#allocation20 + $0x10] sm:$0xff]   ;;  %v2371_v63 = vld [vmem:[#allocation18 + $0x20] sm:$0xff]   ;;  %v2372_v0 = vld [vmem:[#allocation20 + $0x8] sm:$0xff]   ;;  %s1644_s22 = sadd.s32 %s2711_s16, %s1921_s12  ;;  %p2618_p12 = pneg %p2617_p10 }
 0x297   : > { %v2361_v48 = vld [vmem:[#allocation4] sm:$0x78]   ;;  %v2373_v1 = vld [vmem:[#allocation18 + $0x18] sm:$0xff]   ;;  %v2375_v3 = vld [vmem:[#allocation18 + $0x10] sm:$0xff]   ;;  %s1922_s23 = sshll.u32 %s1644_s22, 7  ;;  %s2746_s16 = smov [#allocation21]  }
 0x298   : > { %2053 = vmatpush3.bf16.msra.mxu0 %v2349_v40  ;;  %2073 = vmatpush3.bf16.msra.mxu1 %v2350_v41  ;;  %v1214_v53 = vrot.slane %v2361_v48, 3  ;;  %v2374_v2 = vld [vmem:[#allocation20] sm:$0xff]   ;;  %v2376_v4 = vld [vmem:[#allocation18 + $0x8] sm:$0xff]   ;;  %v1901_v8 = vld [vmem:[%s3263_s6] ss:$0 sm:$0xff]  ;;  %s1646_s14 = scalar_lea.hbm %s3266_s25, %s1922_s23  ;;  %s2619_s6 = sshll.u32 %s2746_s16, 4  ;;  %s2620_s6 = int_to_ptr.vmem [resolvable:$false] %s2619_s6 }
 0x299   : > { %2054 = vmatprep.subr.bf16.mxu0 %v2742_v13  ;;  %2074 = vmatprep.subr.bf16.mxu1 %v2742_v13  ;;  %v2377_v5 = vld [vmem:[#allocation18] sm:$0xff]   ;;  %v1919_v26 = vld [vmem:[%s3265_s27] ss:$0 sm:$0xff]  ;;  %s2621_s4 = scalar_lea.vmem %s2620_s6, 256  ;;  %p2622_p6 = scmp.lt.s32.totalorder %s1649_s17, %s2620_s6 }
 0x29a   : > { %p2623_p13 = scmp.lt.s32.totalorder %s2621_s4, %s2615_s5 }
 0x29c   : > { %2055 = vmatpush3.bf16.msra.mxu0 %v2351_v42  ;;  %2075 = vmatpush3.bf16.msra.mxu1 %v2352_v43  ;;  %p2624_p0 = por %p2623_p13, %p2622_p6 }
 0x29d   : > { %2056 = vmatprep.subr.bf16.mxu0 %v2742_v13  ;;  %2076 = vmatprep.subr.bf16.mxu1 %v2742_v13 }
 0x29e   : > { %p2625_p2 = pnand %p2624_p0, %p2618_p12 }
 0x2a0   : > { %2057 = vmatpush3.bf16.msra.mxu0 %v2353_v44  ;;  %2077 = vmatpush3.bf16.msra.mxu1 %v2354_v45 }
 0x2a1   : > { %2058 = vmatprep.subr.bf16.mxu0 %v2742_v13  ;;  %2078 = vmatprep.subr.bf16.mxu1 %v2742_v13 }
 0x2a4   : > { %2059 = vmatpush3.bf16.msra.mxu0 %v2355_v46  ;;  %2079 = vmatpush3.bf16.msra.mxu1 %v2356_v47 }
 0x2a5   : > { %2060 = vmatprep.subr.bf16.mxu0 %v2742_v13  ;;  %2080 = vmatprep.subr.bf16.mxu1 %v2742_v13 }
 0x2a8   : > { %2061 = vmatpush3.bf16.msra.mxu0 %v2357_v49  ;;  %2081 = vmatpush3.bf16.msra.mxu1 %v2358_v50 }
 0x2a9   : > { %2062 = vmatprep.subr.bf16.mxu0 %v2742_v13  ;;  %2082 = vmatprep.subr.bf16.mxu1 %v2742_v13 }
 0x2ac   : > { %2063 = vmatpush3.bf16.msra.mxu0 %v2359_v51  ;;  %2083 = vmatpush3.bf16.msra.mxu1 %v2360_v52 }
 0x2ad   : > { %2088 = vmatprep.subr.bf16.mxu0 %v2742_v13  ;;  %2108 = vmatprep.subr.bf16.mxu1 %v2742_v13 }
 0x2af   : > { %2065 = vmatmul.mubr.bf16.vlgmr.msra.gmra.mxu0 %v1214_v53  ;;  %2085 = vmatmul.mubr.bf16.vlgmr.msra.gmra.mxu1 %v1173_v36 }
 0x2b0   : > { %2089 = vmatpush3.bf16.msra.mxu0 %v2365_v54  ;;  %2109 = vmatpush3.bf16.msra.mxu1 %v2362_v55 }
 0x2b1   : > { %2090 = vmatprep.subr.bf16.mxu0 %v2742_v13  ;;  %2110 = vmatprep.subr.bf16.mxu1 %v2742_v13 }
 0x2b2   : > { %2124 = vmatprep.mubr.msk.bf16.mxu1 %vm2743_vm6, %v2742_v13  ;;  %2104 = vmatprep.mubr.msk.bf16.mxu0 %vm2743_vm6, %v2742_v13 }
 0x2b4   : > { %2091 = vmatpush3.bf16.msra.mxu0 %v2367_v56  ;;  %2111 = vmatpush3.bf16.msra.mxu1 %v2363_v57 }
 0x2b5   : > { %2092 = vmatprep.subr.bf16.mxu0 %v2742_v13  ;;  %2112 = vmatprep.subr.bf16.mxu1 %v2742_v13 }
 0x2b8   : > { %2093 = vmatpush3.bf16.msra.mxu0 %v2369_v58  ;;  %2113 = vmatpush3.bf16.msra.mxu1 %v2364_v59 }
 0x2b9   : > { %2094 = vmatprep.subr.bf16.mxu0 %v2742_v13  ;;  %2114 = vmatprep.subr.bf16.mxu1 %v2742_v13 }
 0x2bc   : > { %2115 = vmatpush3.bf16.msra.mxu1 %v2366_v60  ;;  %2095 = vmatpush3.bf16.msra.mxu0 %v2371_v63 }
 0x2bd   : > { %2116 = vmatprep.subr.bf16.mxu1 %v2742_v13  ;;  %2096 = vmatprep.subr.bf16.mxu0 %v2742_v13 }
 0x2c0   : > { %2117 = vmatpush3.bf16.msra.mxu1 %v2368_v61  ;;  %2097 = vmatpush3.bf16.msra.mxu0 %v2373_v1 }
 0x2c1   : > { %2118 = vmatprep.subr.bf16.mxu1 %v2742_v13  ;;  %2098 = vmatprep.subr.bf16.mxu0 %v2742_v13 }
 0x2c4   : > { %2119 = vmatpush3.bf16.msra.mxu1 %v2370_v62  ;;  %2099 = vmatpush3.bf16.msra.mxu0 %v2375_v3 }
 0x2c5   : > { %2120 = vmatprep.subr.bf16.mxu1 %v2742_v13  ;;  %2100 = vmatprep.subr.bf16.mxu0 %v2742_v13 }
 0x2c8   : > { %2121 = vmatpush3.bf16.msra.mxu1 %v2372_v0  ;;  %2101 = vmatpush3.bf16.msra.mxu0 %v2376_v4 }
 0x2c9   : > { %2122 = vmatprep.subr.bf16.mxu1 %v2742_v13  ;;  %2102 = vmatprep.subr.bf16.mxu0 %v2742_v13 }
 0x2cc   : > { %2123 = vmatpush3.bf16.msra.mxu1 %v2374_v2  ;;  %2103 = vmatpush3.bf16.msra.mxu0 %v2377_v5 }
 0x36f   : > { %v1298_v6 = vpop.f32.mrf.mxu0  ;;  %v1386_v7 = vpop.f32.mrf.mxu1 }
 0x370   : > { %v1387_v9 = vadd.f32 %v1386_v7, %v1298_v6 }
 0x371   : > { %v2066_v10 = vpop.f32.mrf.mxu0  ;;  %v2086_v11 = vpop.f32.mrf.mxu1 }
 0x372   : > { %v1399_v12 = vadd.f32 %v1901_v8, %v1387_v9 }
 0x373   : > { %v1301_v14 = vpop.f32.mrf.mxu0  ;;  %v1389_v15 = vpop.f32.mrf.mxu1 }
 0x374   : > { %v1400_v16 = vmax.f32 %v1399_v12, 0.0 }
 0x375   : > { %v2067_v17 = vpop.f32.mrf.mxu0  ;;  %v2087_v18 = vpop.f32.mrf.mxu1 }
 0x376   : > { %v1401_v19 = vpack.c.bf16 %v1400_v16, %v1400_v16 }
 0x378   : > { %1402 = vst [vmem:[#allocation5 + $0x4] sm:$0xf] %v1401_v19  ;;  %2125 = vmatmul.mubr.bf16.vlgmr.msra.gmra.mxu1 %v1401_v19 }
 0x37f   : > { %v2378_v13 = vld [vmem:[#allocation5] sm:$0x78]  }
 0x380   : > { %v1442_v20 = vrot.slane %v2378_v13, 3 }
 0x382   : > { %2105 = vmatmul.mubr.bf16.vlgmr.msra.gmra.mxu0 %v1442_v20 }
 0x438   : > { %v1614_v21 = vpop.f32.mrf.mxu1 }
 0x43a   : > { %v2126_v22 = vpop.f32.mrf.mxu1 }
 0x43c   : > { %v1617_v23 = vpop.f32.mrf.mxu1 }
 0x43e   : > { %v2127_v24 = vpop.f32.mrf.mxu1 }
 0x442   : > { %v1526_v25 = vpop.f32.mrf.mxu0 }
 0x443   : > { %v1615_v27 = vadd.f32 %v1614_v21, %v1526_v25 }
 0x444   : > { %v2106_v28 = vpop.f32.mrf.mxu0 }
 0x445   : > { %v1627_v29 = vadd.f32 %v1919_v26, %v1615_v27 }
 0x446   : > { %v1529_v30 = vpop.f32.mrf.mxu0 }
 0x447   : > { %v1628_v32 = vmax.f32 %v1627_v29, 0.0 }
 0x448   : > { %v2107_v33 = vpop.f32.mrf.mxu0 }
 0x449   : > { %v1629_v34 = vadd.f32 %v1628_v32, %v3102_v31 }
 0x44b   : > { %v1630_v35 = vmax.f32 %v1629_v34, 0.0 }
 0x44d   : > { %1631 = vst [vmem:[%s3051_s11] sm:$0xff] %v1630_v35 }
 0x44e   : > { %2628 = shalt.err (!%p2625_p2)
}
 0x44f   : > { %s2629_s9 = scalar_lea.hbm %s1646_s14, 128  ;;  %s2633_s10 = scalar_lea.hbm %s3266_s25, 512 }
 0x450   : > { %p2630_p4 = scmp.ne.s32.totalorder %s1646_s14, %s2629_s9  ;;  %p2634_p11 = scmp.lt.s32.totalorder %s1646_s14, %s3266_s25 }
 0x451   : > { %p2635_p3 = scmp.lt.s32.totalorder %s2633_s10, %s2629_s9 }
 0x452   : > { %p2631_p5 = pnand %p2630_p4, %p3267_p8 }
 0x453   : > { %p2636_p1 = por %p2635_p3, %p2634_p11 }
 0x454   : > { %p2632_p9 = pneg %p2631_p5 }
 0x456   : > { %p2637_p7 = pnand %p2636_p1, %p2632_p9 }
 0x458   : > { %2640 = shalt.err (!%p2637_p7)
}
 0x459   : > { %2162 = dma.vmem_to_hbm [thread:$0]  (%p3267_p8), %s1649_s17, 128, %s1646_s14, %s1633_s7  }
 0x45a PF: > { %p2214_p10 = scmp.ge.s32.totalorder %s2727_s20, 2  ;;  %s1660_s22 = sand.u32 1, %s2699_s29  }
 0x45b   : > { %p3268_p12 = scmp.ne.s32.totalorder %s3259_s24, 0  ;;  %s1661_s23 = scalar_lea.sflag [#allocation8], %s1660_s22 }
 0x45d   : > { %p2194_p6 = pnand %p2214_p10, %p3268_p12 }
 0x45f   : > { %p2195_p13 = pneg %p2194_p6 }
 0x461   : > { %2694 = dma.done.wait (%p2195_p13), %s1661_s23, 128  }
 0x462   : > { %2696 = vsyncadd (%p2195_p13), %s1661_s23, 4294967168  ;;  %s34_s20 = sadd.s32 1, %s2727_s20   ;;  %s3269_s29 = smov %s2703_s30 }
 0x463   : > { %p31_p0 = scmp.ge.s32.totalorder %s34_s20, 6   ;;  %s3270_s30 = smov %s2707_s15 }
 0x464   : > { %s3271_s15 = smov %s3007_s2  ;;  %s3272_s16 = smov %s2719_s18 }
 0x465   : > { %s3273_s17 = smov %s2723_s19  ;;  %s3274_s18 = smov %s3277_s13 }
 0x466   : > { %s3275_s19 = smov %s3281_s26  ;;  %33 = sbr.rel (!%p31_p0) target bundleno = 25 (0x19), region = 169 }
 0x46b   :  { %1666 = vsyncpa [#allocation7], 1 }
 0x46c   :  { %1668 = vsyncpa [#allocation7 + $0x1], 1 }
 0x46d   :  { %1669 = vsyncpa [#allocation10], 1 }
 0x46e   :  { %1670 = vsyncpa [#allocation13], 1 }
 0x46f   :  { %1671 = vsyncpa [#allocation16], 1 }
 0x470   :  { %1672 = vsyncpa [#allocation19], 1 }
 0x471   :  { %1673 = vsyncpa [#allocation8], 1 }
 0x472   :  { %1675 = vsyncpa [#allocation8 + $0x1], 1 }

</bundles_post_ra>
